<compile_context>
chip_gen: v7x
topology: tpu7x:2x2x1
jax: 0.10.0
libtpu: 0.0.40
codegen_flags: <defaults>
</compile_context>

<pallas_src>
import functools

import jax
import jax.numpy as jnp
from jax.experimental import pallas as pl
from jax.experimental.pallas import tpu as pltpu


# ----------------------------- Pallas kernels --------------------------------

def gcn_layer1_kernel(a_ref, x_ref, w1_ref, b1_ref, w2_ref, xw2_ref, acc_ref,
                      *, tile_k):
    """XW2 = relu((A @ X) @ W1 + b1) @ W2 for one row tile of A.

    Grid = (row_tile, k_tile), reduction axis last.
      a_ref   : (tile_r, tile_k)  bf16  streamed tile of normalized adjacency
      x_ref   : (N_pad, Fin_p)    bf16  resident node features
      w1_ref  : (Fin_p, Hid_p)    f32   resident
      b1_ref  : (1, Hid_p)        f32   resident
      w2_ref  : (Hid_p, Fout_p)   f32   resident
      xw2_ref : (tile_r, Fout_p)  bf16  output row tile (layer-2 feature input)
      acc_ref : (tile_r, Fin_p)   f32   scratch accumulator for A @ X
    """
    k = pl.program_id(1)

    @pl.when(k == 0)
    def _():
        acc_ref[...] = jnp.zeros_like(acc_ref)

    k_off = pl.multiple_of(k * tile_k, tile_k)
    x_blk = x_ref[pl.ds(k_off, tile_k), :]                    # (tile_k, Fin_p) bf16
    acc_ref[...] += jnp.dot(a_ref[...], x_blk,
                            preferred_element_type=jnp.float32)

    @pl.when(k == pl.num_programs(1) - 1)
    def _():
        # (A @ X) @ W1 + b1 in f32 (accumulator never downcast to bf16),
        # ReLU in-register, then hoist the layer-2 feature transform (H @ W2)
        # so the second kernel only does the N^2 aggregation matmul.
        h = jnp.dot(acc_ref[...], w1_ref[...],
                    preferred_element_type=jnp.float32)
        h = jnp.maximum(h + b1_ref[...], 0.0)
        xw2 = jnp.dot(h, w2_ref[...], preferred_element_type=jnp.float32)
        xw2_ref[...] = xw2.astype(xw2_ref.dtype)


def gcn_layer2_kernel(a_ref, xw2_ref, b2_ref, o_ref, acc_ref, *, tile_k):
    """OUT = A @ XW2 + b2 for one row tile of A.  Grid = (row_tile, k_tile).

      a_ref   : (tile_r, tile_k)  bf16  streamed tile of normalized adjacency
      xw2_ref : (N_pad, Fout_p)   bf16  resident layer-2 feature input
      b2_ref  : (1, Fout_p)       f32   resident
      o_ref   : (tile_r, Fout_p)  f32   output row tile
      acc_ref : (tile_r, Fout_p)  f32   scratch accumulator
    """
    k = pl.program_id(1)

    @pl.when(k == 0)
    def _():
        acc_ref[...] = jnp.zeros_like(acc_ref)

    k_off = pl.multiple_of(k * tile_k, tile_k)
    xw2_blk = xw2_ref[pl.ds(k_off, tile_k), :]                # (tile_k, Fout_p) bf16
    acc_ref[...] += jnp.dot(a_ref[...], xw2_blk,
                            preferred_element_type=jnp.float32)

    @pl.when(k == pl.num_programs(1) - 1)
    def _():
        o_ref[...] = (acc_ref[...] + b2_ref[...]).astype(o_ref.dtype)


# ------------------------------ Pallas wrapper --------------------------------

def _round_up(x, m):
    return (x + m - 1) // m * m


def _tiling(n):
    """Pick (n_pad, tile_r, tile_k) for the N^2 adjacency stream.

    Wide-k (lane-contiguous) blocks amortize the ~0.35us per-grid-step
    overhead while the f32 accumulator only scales with tile_r.  N is padded
    to a multiple of the tiles so we never fall back to 128/256 blocks.
    """
    n_min = _round_up(max(n, 1), 128)
    if n_min <= 512:
        return 512, 512, 512                     # single (512, 512) block
    n_pad = _round_up(n_min, 512)                # cap padding waste at 512
    tile_k = 512
    for cand in (2048, 1024):                    # prefer >=2 MiB A blocks
        if n_pad % cand == 0:
            tile_k = cand
            break
    return n_pad, 512, tile_k


def _vmem_limit_bytes():
    """Per-generation scoped-VMEM limit (~85% of physical, <= ~110 MiB)."""
    cap = 64 * 1024 * 1024       # conservative fallback: v7x physical VMEM
    try:
        info = pltpu.get_tpu_info()
        for attr in ("vmem_capacity_bytes", "vmem_size_bytes", "vmem_bytes"):
            val = getattr(info, attr, None)
            if val:
                cap = int(val)
                break
    except Exception:
        pass
    return max(32 * 1024 * 1024, min(int(cap * 0.85), 110 * 1024 * 1024))


def gcn_two_layer(a_norm, x, w1, b1, w2, b2):
    """out = A @ relu(A @ X @ W1 + b1) @ W2 + b2 via two Pallas kernels."""
    n = x.shape[0]
    f_in, hid = w1.shape
    f_out = w2.shape[1]

    n_pad, tile_r, tile_k = _tiling(n)
    fin_p = _round_up(f_in, 128)
    hid_p = _round_up(hid, 128)
    fout_p = _round_up(f_out, 128)

    # Zero padding is exact (padded rows/cols contribute nothing to valid rows).
    # A / X are built directly in bf16 -- no f32 (N, N) temporary.
    a_p = jnp.zeros((n_pad, n_pad), jnp.bfloat16).at[:n, :n].set(
        a_norm.astype(jnp.bfloat16))
    x_p = jnp.zeros((n_pad, fin_p), jnp.bfloat16).at[:n, :f_in].set(
        x.astype(jnp.bfloat16))
    w1_p = jnp.zeros((fin_p, hid_p), jnp.float32).at[:f_in, :hid].set(w1)
    b1_p = jnp.zeros((1, hid_p), jnp.float32).at[0, :hid].set(b1)
    w2_p = jnp.zeros((hid_p, fout_p), jnp.float32).at[:hid, :f_out].set(w2)
    b2_p = jnp.zeros((1, fout_p), jnp.float32).at[0, :f_out].set(b2)

    r_tiles = n_pad // tile_r
    k_tiles = n_pad // tile_k
    cparams = pltpu.CompilerParams(
        dimension_semantics=("parallel", "arbitrary"),
        vmem_limit_bytes=_vmem_limit_bytes(),
    )

    # ----- Layer 1 (+ hoisted layer-2 feature transform) -----
    xw2 = pl.pallas_call(
        functools.partial(gcn_layer1_kernel, tile_k=tile_k),
        out_shape=jax.ShapeDtypeStruct((n_pad, fout_p), jnp.bfloat16),
        grid_spec=pltpu.PrefetchScalarGridSpec(
            num_scalar_prefetch=0,
            grid=(r_tiles, k_tiles),              # (row tile, reduction tile)
            in_specs=[
                pl.BlockSpec((tile_r, tile_k), lambda i, k: (i, k)),    # A tile
                pl.BlockSpec((n_pad, fin_p), lambda i, k: (0, 0)),      # X  (resident)
                pl.BlockSpec((fin_p, hid_p), lambda i, k: (0, 0)),      # W1 (resident)
                pl.BlockSpec((1, hid_p), lambda i, k: (0, 0)),          # b1 (resident)
                pl.BlockSpec((hid_p, fout_p), lambda i, k: (0, 0)),     # W2 (resident)
            ],
            out_specs=pl.BlockSpec((tile_r, fout_p), lambda i, k: (i, 0)),
            scratch_shapes=[pltpu.VMEM((tile_r, fin_p), jnp.float32)],
        ),
        compiler_params=cparams,
    )(a_p, x_p, w1_p, b1_p, w2_p)

    # ----- Layer 2: OUT = A @ XW2 + b2 -----
    out_p = pl.pallas_call(
        functools.partial(gcn_layer2_kernel, tile_k=tile_k),
        out_shape=jax.ShapeDtypeStruct((n_pad, fout_p), jnp.float32),
        grid_spec=pltpu.PrefetchScalarGridSpec(
            num_scalar_prefetch=0,
            grid=(r_tiles, k_tiles),
            in_specs=[
                pl.BlockSpec((tile_r, tile_k), lambda i, k: (i, k)),    # A tile
                pl.BlockSpec((n_pad, fout_p), lambda i, k: (0, 0)),     # XW2 (resident)
                pl.BlockSpec((1, fout_p), lambda i, k: (0, 0)),         # b2  (resident)
            ],
            out_specs=pl.BlockSpec((tile_r, fout_p), lambda i, k: (i, 0)),
            scratch_shapes=[pltpu.VMEM((tile_r, fout_p), jnp.float32)],
        ),
        compiler_params=cparams,
    )(a_p, xw2, b2_p)

    return out_p[:n, :f_out]


# ------------------------------- JAX glue ------------------------------------

def build_norm_adj(edge_index, num_nodes):
    """Dense GCN-normalized adjacency: D^{-1/2} (A + I) D^{-1/2}."""
    src = edge_index[0]
    dst = edge_index[1]
    loops = jnp.arange(num_nodes, dtype=edge_index.dtype)
    src = jnp.concatenate([src, loops])
    dst = jnp.concatenate([dst, loops])
    # A_hat[i, j] = number of edges j -> i (self loop included)
    a_hat = jnp.zeros((num_nodes, num_nodes), jnp.float32).at[dst, src].add(1.0)
    deg = a_hat.sum(axis=1)
    d_inv_sqrt = jnp.where(deg > 0.0, jax.lax.rsqrt(jnp.maximum(deg, 1e-12)), 0.0)
    return d_inv_sqrt[:, None] * a_hat * d_inv_sqrt[None, :]


def init_params(key, input_dim, hidden_dim, output_dim):
    """Deterministic Glorot-style init (GCNConv: linear weight + zero bias)."""
    k1, k2 = jax.random.split(key)

    def glorot(k, fan_in, fan_out):
        limit = jnp.sqrt(6.0 / (fan_in + fan_out))
        return jax.random.uniform(k, (fan_in, fan_out), jnp.float32,
                                  minval=-limit, maxval=limit)

    return {
        "w1": glorot(k1, input_dim, hidden_dim),
        "b1": jnp.zeros((hidden_dim,), jnp.float32),
        "w2": glorot(k2, hidden_dim, output_dim),
        "b2": jnp.zeros((output_dim,), jnp.float32),
    }


def gnn_forward(params, x, edge_index):
    a_norm = build_norm_adj(edge_index, x.shape[0])
    return gcn_two_layer(a_norm, x, params["w1"], params["b1"],
                         params["w2"], params["b2"])


def gnn_reference(params, x, edge_index):
    """Pure-JAX f32 reference matching the PyTorch module semantics."""
    a = build_norm_adj(edge_index, x.shape[0])
    h = jnp.maximum(a @ (x @ params["w1"]) + params["b1"], 0.0)
    return a @ (h @ params["w2"]) + params["b2"]


# --------------------------------- main --------------------------------------

if __name__ == "__main__":
    key = jax.random.PRNGKey(0)
    k_x, k_e, k_p = jax.random.split(key, 3)

    num_nodes = 16
    input_dim = 8
    hidden_dim = 32
    output_dim = 4
    num_edges = 32

    x = jax.random.normal(k_x, (num_nodes, input_dim), jnp.float32)
    edge_index = jax.random.randint(k_e, (2, num_edges), 0, num_nodes, jnp.int32)

    params = init_params(k_p, input_dim, hidden_dim, output_dim)

    out = gnn_forward(params, x, edge_index)
    jax.block_until_ready(out)
    assert out.shape == (num_nodes, output_dim)

    # bf16 A/X feeding the MXU with f32 accumulation + f32 weight matmuls.
    ref = gnn_reference(params, x, edge_index)
    err = float(jnp.max(jnp.abs(out - ref)))
    assert err < 5e-2, f"kernel mismatch vs reference: max|diff|={err}"

    print("KERNEL_OK")
</pallas_src>

<mosaic_0001>
module attributes {stable_mosaic.version = 11 : i64} {
  func.func @gcn_layer1_kernel(%arg0: i32, %arg1: i32, %arg2: memref<512x512xbf16, #tpu.memory_space<vmem>>, %arg3: memref<512x128xbf16, #tpu.memory_space<vmem>>, %arg4: memref<128x128xf32, #tpu.memory_space<vmem>>, %arg5: memref<1x128xf32, #tpu.memory_space<vmem>>, %arg6: memref<128x128xf32, #tpu.memory_space<vmem>>, %arg7: memref<512x128xbf16, #tpu.memory_space<vmem>>, %arg8: memref<512x128xf32, #tpu.memory_space<vmem>>) attributes {dimension_semantics = [#tpu.dimension_semantics<parallel>, #tpu.dimension_semantics<arbitrary>], iteration_bounds = array<i64: 1, 1>, scalar_prefetch = 0 : i64, scratch_operands = 1 : i64, tpu.core_type = #tpu.core_type<tc>, window_params = [{transform_indices = @transform_0, window_bounds = array<i64: 512, 512>}, {pipeline_mode = #tpu.pipeline_mode<synchronous>, transform_indices = @transform_1, window_bounds = array<i64: 512, 128>}, {pipeline_mode = #tpu.pipeline_mode<synchronous>, transform_indices = @transform_2, window_bounds = array<i64: 128, 128>}, {pipeline_mode = #tpu.pipeline_mode<synchronous>, transform_indices = @transform_3, window_bounds = array<i64: 1, 128>}, {pipeline_mode = #tpu.pipeline_mode<synchronous>, transform_indices = @transform_4, window_bounds = array<i64: 128, 128>}, {transform_indices = @transform_5, window_bounds = array<i64: 512, 128>}]} {
    %c0_i32 = arith.constant 0 : i32
    %0 = arith.cmpi eq, %arg1, %c0_i32 : i32
    %1 = arith.extui %0 : i1 to i32
    %c0_i32_0 = arith.constant 0 : i32
    %2 = arith.cmpi ne, %1, %c0_i32_0 : i32
    scf.if %2 {
      %cst_9 = arith.constant 0.000000e+00 : f32
      %15 = vector.broadcast %cst_9 : f32 to vector<512x128xf32>
      %c0_10 = arith.constant 0 : index
      %c0_11 = arith.constant 0 : index
      %16 = vector.load %arg8[%c0_10, %c0_11] : memref<512x128xf32, #tpu.memory_space<vmem>>, vector<512x128xf32>
      tpu.vector_store %arg8[%c0_10, %c0_11], %15 {strides = array<i32>} : memref<512x128xf32, #tpu.memory_space<vmem>>, vector<512x128xf32>,
    } else {
    }
    %c512_i32 = arith.constant 512 : i32
    %3 = arith.muli %arg1, %c512_i32 : i32
    %4 = tpu.assume_multiple %3, 512 : i32
    %5 = arith.index_cast %4 : i32 to index
    %c0 = arith.constant 0 : index
    %6 = vector.load %arg3[%5, %c0] : memref<512x128xbf16, #tpu.memory_space<vmem>>, vector<512x128xbf16>
    %c0_1 = arith.constant 0 : index
    %c0_2 = arith.constant 0 : index
    %7 = vector.load %arg8[%c0_1, %c0_2] : memref<512x128xf32, #tpu.memory_space<vmem>>, vector<512x128xf32>
    %c0_3 = arith.constant 0 : index
    %c0_4 = arith.constant 0 : index
    %8 = vector.load %arg2[%c0_3, %c0_4] : memref<512x512xbf16, #tpu.memory_space<vmem>>, vector<512x512xbf16>
    %cst = arith.constant dense<0.000000e+00> : vector<512x128xf32>
    %9 = tpu.matmul %8, %6, %cst {dimension_numbers = #tpu.dot_dimension_numbers<[1], [0], [0], [1], [0, 0, 1, 1], [], []>} : vector<512x512xbf16>, vector<512x128xbf16>, vector<512x128xf32> -> vector<512x128xf32>
    %10 = arith.addf %7, %9 : vector<512x128xf32>
    %c0_5 = arith.constant 0 : index
    %c0_6 = arith.constant 0 : index
    %11 = vector.load %arg8[%c0_5, %c0_6] : memref<512x128xf32, #tpu.memory_space<vmem>>, vector<512x128xf32>
    tpu.vector_store %arg8[%c0_5, %c0_6], %10 {strides = array<i32>} : memref<512x128xf32, #tpu.memory_space<vmem>>, vector<512x128xf32>,
    %c0_i32_7 = arith.constant 0 : i32
    %12 = arith.cmpi eq, %arg1, %c0_i32_7 : i32
    %13 = arith.extui %12 : i1 to i32
    %c0_i32_8 = arith.constant 0 : i32
    %14 = arith.cmpi ne, %13, %c0_i32_8 : i32
    scf.if %14 {
      %c0_9 = arith.constant 0 : index
      %c0_10 = arith.constant 0 : index
      %15 = vector.load %arg8[%c0_9, %c0_10] : memref<512x128xf32, #tpu.memory_space<vmem>>, vector<512x128xf32>
      %c0_11 = arith.constant 0 : index
      %c0_12 = arith.constant 0 : index
      %16 = vector.load %arg4[%c0_11, %c0_12] : memref<128x128xf32, #tpu.memory_space<vmem>>, vector<128x128xf32>
      %cst_13 = arith.constant dense<0.000000e+00> : vector<512x128xf32>
      %17 = tpu.matmul %15, %16, %cst_13 {dimension_numbers = #tpu.dot_dimension_numbers<[1], [0], [0], [1], [0, 0, 1, 1], [], []>} : vector<512x128xf32>, vector<128x128xf32>, vector<512x128xf32> -> vector<512x128xf32>
      %c0_14 = arith.constant 0 : index
      %c0_15 = arith.constant 0 : index
      %18 = vector.load %arg5[%c0_14, %c0_15] : memref<1x128xf32, #tpu.memory_space<vmem>>, vector<1x128xf32>
      %19 = vector.broadcast %18 : vector<1x128xf32> to vector<512x128xf32>
      %20 = arith.addf %17, %19 : vector<512x128xf32>
      %cst_16 = arith.constant 0.000000e+00 : f32
      %21 = vector.broadcast %cst_16 : f32 to vector<512x128xf32>
      %22 = arith.maximumf %20, %21 : vector<512x128xf32>
      %c0_17 = arith.constant 0 : index
      %c0_18 = arith.constant 0 : index
      %23 = vector.load %arg6[%c0_17, %c0_18] : memref<128x128xf32, #tpu.memory_space<vmem>>, vector<128x128xf32>
      %cst_19 = arith.constant dense<0.000000e+00> : vector<512x128xf32>
      %24 = tpu.matmul %22, %23, %cst_19 {dimension_numbers = #tpu.dot_dimension_numbers<[1], [0], [0], [1], [0, 0, 1, 1], [], []>} : vector<512x128xf32>, vector<128x128xf32>, vector<512x128xf32> -> vector<512x128xf32>
      %25 = arith.truncf %24 : vector<512x128xf32> to vector<512x128xbf16>
      %c0_20 = arith.constant 0 : index
      %c0_21 = arith.constant 0 : index
      %26 = vector.load %arg7[%c0_20, %c0_21] : memref<512x128xbf16, #tpu.memory_space<vmem>>, vector<512x128xbf16>
      tpu.vector_store %arg7[%c0_20, %c0_21], %25 {strides = array<i32>} : memref<512x128xbf16, #tpu.memory_space<vmem>>, vector<512x128xbf16>,
    } else {
    }
    return
  }
  func.func @transform_0(%arg0: i32, %arg1: i32) -> (i32, i32) {
    %c0_i32 = arith.constant 0 : i32
    return %arg0, %arg1 : i32, i32
  }
  func.func @transform_1(%arg0: i32, %arg1: i32) -> (i32, i32) {
    %c0_i32 = arith.constant 0 : i32
    %c0_i32_0 = arith.constant 0 : i32
    %c0_i32_1 = arith.constant 0 : i32
    return %c0_i32, %c0_i32_0 : i32, i32
  }
  func.func @transform_2(%arg0: i32, %arg1: i32) -> (i32, i32) {
    %c0_i32 = arith.constant 0 : i32
    %c0_i32_0 = arith.constant 0 : i32
    %c0_i32_1 = arith.constant 0 : i32
    return %c0_i32, %c0_i32_0 : i32, i32
  }
  func.func @transform_3(%arg0: i32, %arg1: i32) -> (i32, i32) {
    %c0_i32 = arith.constant 0 : i32
    %c0_i32_0 = arith.constant 0 : i32
    %c0_i32_1 = arith.constant 0 : i32
    return %c0_i32, %c0_i32_0 : i32, i32
  }
  func.func @transform_4(%arg0: i32, %arg1: i32) -> (i32, i32) {
    %c0_i32 = arith.constant 0 : i32
    %c0_i32_0 = arith.constant 0 : i32
    %c0_i32_1 = arith.constant 0 : i32
    return %c0_i32, %c0_i32_0 : i32, i32
  }
  func.func @transform_5(%arg0: i32, %arg1: i32) -> (i32, i32) {
    %c0_i32 = arith.constant 0 : i32
    %c0_i32_0 = arith.constant 0 : i32
    return %arg0, %c0_i32 : i32, i32
  }
}

</mosaic_0001>

<bundles_post_ra>
// kernel: tpu_custom_call.1
= control target key start
LH: loop header
LB: loop body
LE: loop exit
PB: predicated region body
PF: predicated region fallthrough
CT: control target
= control target key end

     0   :  { %10 = vsyncpa [#allocation4], 0  ;;  %s4988_s0 = inlined_call_operand.hbm [shape: bf16[512,512], index: 0, kind: input, shape index: {}]   ;;  %s4989_s1 = inlined_call_operand.hbm [shape: bf16[512,128], index: 1, kind: input, shape index: {}]   ;;  %s4990_s2 = inlined_call_operand.hbm [shape: f32[128,128], index: 2, kind: input, shape index: {}]   ;;  %s4991_s3 = inlined_call_operand.vmem [shape: f32[1,128], index: 3, kind: input, shape index: {}]   ;;  %s4992_s4 = inlined_call_operand.hbm [shape: f32[128,128], index: 4, kind: input, shape index: {}]   ;;  %s4993_s5 = inlined_call_operand.hbm [shape: bf16[512,128], index: 5, kind: output, shape index: {}]  }
   0x1   :  { %11 = vsyncpa [#allocation7], 0 }
   0x2   :  { %12 = vsyncpa [#allocation10], 0 }
   0x3   :  { %13 = vsyncpa [#allocation5], 0  ;;  %s4667_s18 = smov [#allocation6]   ;;  %s4549_s22 = scalar_lea.hbm %s4989_s1, 4096 }
   0x4   :  { %s31_s19 = sshll.u32 %s4667_s18, 4  ;;  %p4550_p0 = scmp.ne.s32.totalorder %s4989_s1, %s4549_s22  ;;  %s32_s19 = int_to_ptr.vmem [resolvable:$true] %s31_s19 }
   0x5   :  { %p4553_p1 = scmp.lt.u32.totalorder %s4549_s22, %s4989_s1 }
   0x7   :  { %p4555_p2 = pnand %p4553_p1, %p4550_p0 }
   0x9   :  { %4558 = shalt.err (!%p4555_p2)
}
   0xa   :  { %s4559_s27 = scalar_lea.vmem %s32_s19, 4096  ;;  %p4564_p4 = scmp.lt.s32.totalorder %s32_s19, %s32_s19 }
   0xb   :  { %p4560_p3 = scmp.ne.s32.totalorder %s32_s19, %s4559_s27  ;;  %p4565_p5 = scmp.lt.s32.totalorder %s4559_s27, %s4559_s27 }
   0xd   :  { %p4566_p6 = por %p4565_p5, %p4564_p4 }
   0xf   :  { %p4567_p7 = pnand %p4566_p6, %p4560_p3 }
  0x11   :  { %4570 = shalt.err (!%p4567_p7)
}
  0x12   :  { %s4668_s28 = smov 64   ;;  %s4669_s29 = smov 4  }
  0x13   :  { %37 = dma.hbm_to_vmem [thread:$0]  %s4989_s1, 4096, %s32_s19, [#allocation7], %s4668_s28, %s4668_s28, %s4669_s29  }
  0x14   :  { %s4670_s7 = smov [#allocation3]   ;;  %s4571_s11 = scalar_lea.hbm %s4988_s0, 16384 }
  0x15   :  { %s19_s8 = sshll.u32 %s4670_s7, 4  ;;  %p4572_p8 = scmp.ne.s32.totalorder %s4988_s0, %s4571_s11  ;;  %s20_s8 = int_to_ptr.vmem [resolvable:$true] %s19_s8 }
  0x16   :  { %p4575_p9 = scmp.lt.u32.totalorder %s4571_s11, %s4988_s0 }
  0x18   :  { %p4577_p10 = pnand %p4575_p9, %p4572_p8 }
  0x1a   :  { %4580 = shalt.err (!%p4577_p10)
}
  0x1b   :  { %s4581_s16 = scalar_lea.vmem %s20_s8, 16384  ;;  %p4586_p12 = scmp.lt.s32.totalorder %s20_s8, %s20_s8 }
  0x1c   :  { %p4582_p11 = scmp.ne.s32.totalorder %s20_s8, %s4581_s16  ;;  %p4587_p13 = scmp.lt.s32.totalorder %s4581_s16, %s4581_s16 }
  0x1e   :  { %p4588_p0 = por %p4587_p13, %p4586_p12 }
  0x20   :  { %p4589_p1 = pnand %p4588_p0, %p4582_p11 }
  0x22   :  { %4592 = shalt.err (!%p4589_p1)
}
  0x23   :  { %s4671_s1 = smov 256   ;;  %s4672_s17 = smov 16  }
  0x24   :  { %25 = dma.hbm_to_vmem [thread:$0]  %s4988_s0, 16384, %s20_s8, [#allocation4], %s4671_s1, %s4671_s1, %s4672_s17  }
  0x25   :  { %s4673_s20 = smov [#allocation8]   ;;  %s4593_s24 = scalar_lea.hbm %s4990_s2, 2048 }
  0x26   :  { %s43_s21 = sshll.u32 %s4673_s20, 4  ;;  %p4594_p2 = scmp.ne.s32.totalorder %s4990_s2, %s4593_s24  ;;  %s44_s21 = int_to_ptr.vmem [resolvable:$true] %s43_s21 }
  0x27   :  { %p4597_p3 = scmp.lt.u32.totalorder %s4593_s24, %s4990_s2 }
  0x29   :  { %p4599_p4 = pnand %p4597_p3, %p4594_p2 }
  0x2b   :  { %4602 = shalt.err (!%p4599_p4)
}
  0x2c   :  { %s4603_s6 = scalar_lea.vmem %s44_s21, 2048  ;;  %p4608_p6 = scmp.lt.s32.totalorder %s44_s21, %s44_s21 }
  0x2d   :  { %p4604_p5 = scmp.ne.s32.totalorder %s44_s21, %s4603_s6  ;;  %p4609_p7 = scmp.lt.s32.totalorder %s4603_s6, %s4603_s6 }
  0x2f   :  { %p4610_p8 = por %p4609_p7, %p4608_p6 }
  0x31   :  { %p4611_p9 = pnand %p4610_p8, %p4604_p5 }
  0x33   :  { %4614 = shalt.err (!%p4611_p9)
}
  0x34   :  { %s4674_s0 = smov 128   ;;  %s4675_s7 = smov 8  }
  0x35   :  { %49 = dma.hbm_to_vmem [thread:$0]  %s4990_s2, 2048, %s44_s21, [#allocation7], %s4674_s0, %s4674_s0, %s4675_s7  }
  0x36   :  { %s4676_s10 = smov [#allocation9]   ;;  %s4615_s14 = scalar_lea.hbm %s4992_s4, 2048 }
  0x37   :  { %s57_s11 = sshll.u32 %s4676_s10, 4  ;;  %p4616_p10 = scmp.ne.s32.totalorder %s4992_s4, %s4615_s14  ;;  %s58_s11 = int_to_ptr.vmem [resolvable:$true] %s57_s11 }
  0x38   :  { %p4619_p11 = scmp.lt.u32.totalorder %s4615_s14, %s4992_s4 }
  0x3a   :  { %p4621_p12 = pnand %p4619_p11, %p4616_p10 }
  0x3c   :  { %4624 = shalt.err (!%p4621_p12)
}
  0x3d   :  { %s4625_s18 = scalar_lea.vmem %s58_s11, 2048  ;;  %p4630_p0 = scmp.lt.s32.totalorder %s58_s11, %s58_s11 }
  0x3e   :  { %p4626_p13 = scmp.ne.s32.totalorder %s58_s11, %s4625_s18  ;;  %p4631_p1 = scmp.lt.s32.totalorder %s4625_s18, %s4625_s18 }
  0x40   :  { %p4632_p2 = por %p4631_p1, %p4630_p0 }
  0x42   :  { %p4633_p3 = pnand %p4632_p2, %p4626_p13 }
  0x44   :  { %4636 = shalt.err (!%p4633_p3)
}
  0x45   :  { %63 = dma.hbm_to_vmem [thread:$0]  %s4992_s4, 2048, %s58_s11, [#allocation10], %s4674_s0, %s4674_s0, %s4675_s7  }
  0x46   :  { %4659 = dma.done.wait [#allocation4], 16384  }
  0x47   :  { %4660 = vsyncadd [#allocation4], 4294950912 }
  0x48   :  { %4661 = dma.done.wait [#allocation7], 6144  }
  0x49   :  { %4662 = vsyncadd [#allocation7], 4294961152 }
  0x4a   :  { %4663 = dma.done.wait [#allocation10], 2048  }
  0x4b   :  { %4664 = vsyncadd [#allocation10], 4294965248  ;;  %v4677_v0 = vmov 0   ;;  %v4325_v1 = vld [vmem:[#allocation6] sm:$0xff]   ;;  %v4326_v2 = vld [vmem:[#allocation6 + $0x8] sm:$0xff]  }
  0x4c   :  { %1238 = vmatprep.subr.bf16.mxu0 %v4677_v0  ;;  %4185 = vmatprep.subr.bf16.mxu1 %v4677_v0  ;;  %v4327_v3 = vld [vmem:[#allocation6 + $0x10] sm:$0xff]   ;;  %v4328_v4 = vld [vmem:[#allocation6 + $0x18] sm:$0xff]   ;;  %v4329_v5 = vld [vmem:[#allocation6 + $0x20] sm:$0xff]  }
  0x4d   :  { %1239 = vmatpush1.bf16.msra.mxu0 %v4325_v1  ;;  %4201 = vmatpush1.bf16.msra.mxu1 %v4325_v1  ;;  %v4343_v6 = vld [vmem:[#allocation3 + $0x4] ss:$16 sps:$4 sm:$0xff]   ;;  %v4330_v7 = vld [vmem:[#allocation6 + $0x28] sm:$0xff]   ;;  %v4332_v9 = vld [vmem:[#allocation6 + $0x38] sm:$0xff]  }
  0x4e   :  { %1240 = vmatprep.subr.bf16.mxu0 %v4677_v0  ;;  %4186 = vmatprep.subr.bf16.mxu1 %v4677_v0  ;;  %v4331_v8 = vld [vmem:[#allocation6 + $0x30] sm:$0xff]   ;;  %v4333_v10 = vld [vmem:[#allocation6 + $0x40] sm:$0xff]   ;;  %v4334_v11 = vld [vmem:[#allocation6 + $0x48] sm:$0xff]  }
  0x4f   :  { %1270 = vmatprep.mubr.bf16.mxu0 %v4343_v6  ;;  %v4335_v12 = vld [vmem:[#allocation6 + $0x50] sm:$0xff]   ;;  %v4336_v13 = vld [vmem:[#allocation6 + $0x58] sm:$0xff]   ;;  %v4337_v14 = vld [vmem:[#allocation6 + $0x60] sm:$0xff]  }
  0x50   :  { %v4338_v15 = vld [vmem:[#allocation6 + $0x68] sm:$0xff]   ;;  %v4339_v16 = vld [vmem:[#allocation6 + $0x70] sm:$0xff]   ;;  %v4340_v17 = vld [vmem:[#allocation6 + $0x78] sm:$0xff]  }
  0x51   :  { %1241 = vmatpush1.bf16.msra.mxu0 %v4326_v2  ;;  %4202 = vmatpush1.bf16.msra.mxu1 %v4326_v2  ;;  %v4341_v18 = vld [vmem:[#allocation3] ss:$16 sps:$4 sm:$0xff]   ;;  %v4345_v20 = vld [vmem:[#allocation3 + $0x24] ss:$16 sps:$4 sm:$0xff]   ;;  %v4348_v21 = vld [vmem:[#allocation6 + $0x88] sm:$0xff]  }
  0x52   :  { %1242 = vmatprep.subr.bf16.mxu0 %v4677_v0  ;;  %4187 = vmatprep.subr.bf16.mxu1 %v4677_v0  ;;  %v4344_v19 = vld [vmem:[#allocation6 + $0x80] sm:$0xff]   ;;  %v4352_v24 = vld [vmem:[#allocation6 + $0x90] sm:$0xff]   ;;  %v4356_v25 = vld [vmem:[#allocation6 + $0x98] sm:$0xff]  }
  0x53   :  { %v4347_v22 = vld [vmem:[#allocation3 + $0x20] ss:$16 sps:$4 sm:$0xff]   ;;  %v4349_v23 = vld [vmem:[#allocation3 + $0x44] ss:$16 sps:$4 sm:$0xff]   ;;  %v4364_v29 = vld [vmem:[#allocation6 + $0xa8] sm:$0xff]  }
  0x54   :  { %v4351_v26 = vld [vmem:[#allocation3 + $0x40] ss:$16 sps:$4 sm:$0xff]   ;;  %v4353_v27 = vld [vmem:[#allocation3 + $0x64] ss:$16 sps:$4 sm:$0xff]   ;;  %v4372_v33 = vld [vmem:[#allocation6 + $0xb8] sm:$0xff]  }
  0x55   :  { %1243 = vmatpush1.bf16.msra.mxu0 %v4327_v3  ;;  %4203 = vmatpush1.bf16.msra.mxu1 %v4327_v3  ;;  %v4360_v28 = vld [vmem:[#allocation6 + $0xa0] sm:$0xff]   ;;  %v4368_v32 = vld [vmem:[#allocation6 + $0xb0] sm:$0xff]   ;;  %v4380_v37 = vld [vmem:[#allocation6 + $0xc8] sm:$0xff]  }
  0x56   :  { %1244 = vmatprep.subr.bf16.mxu0 %v4677_v0  ;;  %4188 = vmatprep.subr.bf16.mxu1 %v4677_v0  ;;  %v4355_v30 = vld [vmem:[#allocation3 + $0x60] ss:$16 sps:$4 sm:$0xff]   ;;  %v4357_v31 = vld [vmem:[#allocation3 + $0x84] ss:$16 sps:$4 sm:$0xff]   ;;  %v4388_v41 = vld [vmem:[#allocation6 + $0xd8] sm:$0xff]  }
  0x57   :  { %v4359_v34 = vld [vmem:[#allocation3 + $0x80] ss:$16 sps:$4 sm:$0xff]   ;;  %v4361_v35 = vld [vmem:[#allocation3 + $0xa4] ss:$16 sps:$4 sm:$0xff]   ;;  %v4396_v45 = vld [vmem:[#allocation6 + $0xe8] sm:$0xff]  }
  0x58   :  { %v4376_v36 = vld [vmem:[#allocation6 + $0xc0] sm:$0xff]   ;;  %v4384_v40 = vld [vmem:[#allocation6 + $0xd0] sm:$0xff]   ;;  %v4404_v49 = vld [vmem:[#allocation6 + $0xf8] sm:$0xff]  }
  0x59   :  { %1245 = vmatpush1.bf16.msra.mxu0 %v4328_v4  ;;  %4204 = vmatpush1.bf16.msra.mxu1 %v4328_v4  ;;  %v4363_v38 = vld [vmem:[#allocation3 + $0xa0] ss:$16 sps:$4 sm:$0xff]   ;;  %v4365_v39 = vld [vmem:[#allocation3 + $0xc4] ss:$16 sps:$4 sm:$0xff]  }
  0x5a   :  { %1246 = vmatprep.subr.bf16.mxu0 %v4677_v0  ;;  %4189 = vmatprep.subr.bf16.mxu1 %v4677_v0  ;;  %v4367_v42 = vld [vmem:[#allocation3 + $0xc0] ss:$16 sps:$4 sm:$0xff]   ;;  %v4369_v43 = vld [vmem:[#allocation3 + $0xe4] ss:$16 sps:$4 sm:$0xff]  }
  0x5b   :  { %v4392_v44 = vld [vmem:[#allocation6 + $0xe0] sm:$0xff]   ;;  %v4400_v48 = vld [vmem:[#allocation6 + $0xf0] sm:$0xff]  }
  0x5c   :  { %v4371_v46 = vld [vmem:[#allocation3 + $0xe0] ss:$16 sps:$4 sm:$0xff]   ;;  %v4373_v47 = vld [vmem:[#allocation3 + $0x104] ss:$16 sps:$4 sm:$0xff]  }
  0x5d   :  { %1247 = vmatpush1.bf16.msra.mxu0 %v4329_v5  ;;  %4205 = vmatpush1.bf16.msra.mxu1 %v4329_v5  ;;  %v4375_v50 = vld [vmem:[#allocation3 + $0x100] ss:$16 sps:$4 sm:$0xff]   ;;  %v4377_v51 = vld [vmem:[#allocation3 + $0x124] ss:$16 sps:$4 sm:$0xff]  }
  0x5e   :  { %1248 = vmatprep.subr.bf16.mxu0 %v4677_v0  ;;  %4190 = vmatprep.subr.bf16.mxu1 %v4677_v0  ;;  %v4379_v52 = vld [vmem:[#allocation3 + $0x120] ss:$16 sps:$4 sm:$0xff]   ;;  %v4381_v53 = vld [vmem:[#allocation3 + $0x144] ss:$16 sps:$4 sm:$0xff]  }
  0x5f   :  { %v4383_v54 = vld [vmem:[#allocation3 + $0x140] ss:$16 sps:$4 sm:$0xff]   ;;  %v4385_v55 = vld [vmem:[#allocation3 + $0x164] ss:$16 sps:$4 sm:$0xff]  }
  0x60   :  { %v4438_v56 = vld [vmem:[#allocation3 + $0x200] ss:$16 sps:$4 sm:$0xff]   ;;  %v4440_v57 = vld [vmem:[#allocation3 + $0x204] ss:$16 sps:$4 sm:$0xff]  }
  0x61   :  { %1249 = vmatpush1.bf16.msra.mxu0 %v4330_v7  ;;  %4206 = vmatpush1.bf16.msra.mxu1 %v4330_v7  ;;  %v4387_v58 = vld [vmem:[#allocation3 + $0x160] ss:$16 sps:$4 sm:$0xff]   ;;  %v4389_v59 = vld [vmem:[#allocation3 + $0x184] ss:$16 sps:$4 sm:$0xff]  }
  0x62   :  { %1250 = vmatprep.subr.bf16.mxu0 %v4677_v0  ;;  %4191 = vmatprep.subr.bf16.mxu1 %v4677_v0  ;;  %v4444_v60 = vld [vmem:[#allocation3 + $0x224] ss:$16 sps:$4 sm:$0xff]   ;;  %v4446_v61 = vld [vmem:[#allocation3 + $0x220] ss:$16 sps:$4 sm:$0xff]  }
  0x63   :  { %1398 = vmatprep.mubr.bf16.mxu1 %v4440_v57  ;;  %v4391_v62 = vld [vmem:[#allocation3 + $0x180] ss:$16 sps:$4 sm:$0xff]   ;;  %v4393_v63 = vld [vmem:[#allocation3 + $0x1a4] ss:$16 sps:$4 sm:$0xff]  }
  0x64   :  { %v4452_v1 = vld [vmem:[#allocation3 + $0x240] ss:$16 sps:$4 sm:$0xff]   ;;  %v4397_v3 = vld [vmem:[#allocation3 + $0x1c4] ss:$16 sps:$4 sm:$0xff]  }
  0x65   :  { %1251 = vmatpush1.bf16.msra.mxu0 %v4331_v8  ;;  %4207 = vmatpush1.bf16.msra.mxu1 %v4331_v8  ;;  %v4395_v2 = vld [vmem:[#allocation3 + $0x1a0] ss:$16 sps:$4 sm:$0xff]   ;;  %v4456_v4 = vld [vmem:[#allocation3 + $0x264] ss:$16 sps:$4 sm:$0xff]  }
  0x66   :  { %1252 = vmatprep.subr.bf16.mxu0 %v4677_v0  ;;  %4192 = vmatprep.subr.bf16.mxu1 %v4677_v0  ;;  %v4458_v5 = vld [vmem:[#allocation3 + $0x260] ss:$16 sps:$4 sm:$0xff]   ;;  %v4401_v7 = vld [vmem:[#allocation3 + $0x1e4] ss:$16 sps:$4 sm:$0xff]  }
  0x67   :  { %v4399_v6 = vld [vmem:[#allocation3 + $0x1c0] ss:$16 sps:$4 sm:$0xff]   ;;  %v4462_v8 = vld [vmem:[#allocation3 + $0x284] ss:$16 sps:$4 sm:$0xff]  }
  0x68   :  { %v2017_v57 = vld [vmem:[#allocation8 + $0x30] sm:$0xff] }
  0x69   :  { %1253 = vmatpush1.bf16.msra.mxu0 %v4332_v9  ;;  %4208 = vmatpush1.bf16.msra.mxu1 %v4332_v9  ;;  %v4464_v9 = vld [vmem:[#allocation3 + $0x280] ss:$16 sps:$4 sm:$0xff]  }
  0x6a   :  { %1254 = vmatprep.subr.bf16.mxu0 %v4677_v0  ;;  %4193 = vmatprep.subr.bf16.mxu1 %v4677_v0 }
  0x6d   :  { %1255 = vmatpush1.bf16.msra.mxu0 %v4333_v10  ;;  %4209 = vmatpush1.bf16.msra.mxu1 %v4333_v10  ;;  %v4403_v10 = vld [vmem:[#allocation3 + $0x1e0] ss:$16 sps:$4 sm:$0xff]  }
  0x6e   :  { %1256 = vmatprep.subr.bf16.mxu0 %v4677_v0  ;;  %4194 = vmatprep.subr.bf16.mxu1 %v4677_v0 }
  0x71   :  { %1257 = vmatpush1.bf16.msra.mxu0 %v4334_v11  ;;  %4210 = vmatpush1.bf16.msra.mxu1 %v4334_v11  ;;  %v4407_v11 = vld [vmem:[#allocation3 + $0xc] ss:$16 sps:$4 sm:$0xff]  }
  0x72   :  { %1258 = vmatprep.subr.bf16.mxu0 %v4677_v0  ;;  %4195 = vmatprep.subr.bf16.mxu1 %v4677_v0 }
  0x75   :  { %1259 = vmatpush1.bf16.msra.mxu0 %v4335_v12  ;;  %4211 = vmatpush1.bf16.msra.mxu1 %v4335_v12  ;;  %v4468_v12 = vld [vmem:[#allocation3 + $0x2a4] ss:$16 sps:$4 sm:$0xff]  }
  0x76   :  { %1260 = vmatprep.subr.bf16.mxu0 %v4677_v0  ;;  %4196 = vmatprep.subr.bf16.mxu1 %v4677_v0 }
  0x79   :  { %1261 = vmatpush1.bf16.msra.mxu0 %v4336_v13  ;;  %4212 = vmatpush1.bf16.msra.mxu1 %v4336_v13  ;;  %v4470_v13 = vld [vmem:[#allocation3 + $0x2a0] ss:$16 sps:$4 sm:$0xff]  }
  0x7a   :  { %1262 = vmatprep.subr.bf16.mxu0 %v4677_v0  ;;  %4197 = vmatprep.subr.bf16.mxu1 %v4677_v0 }
  0x7d   :  { %1263 = vmatpush1.bf16.msra.mxu0 %v4337_v14  ;;  %4213 = vmatpush1.bf16.msra.mxu1 %v4337_v14  ;;  %v4405_v14 = vld [vmem:[#allocation3 + $0x8] ss:$16 sps:$4 sm:$0xff]  }
  0x7e   :  { %1264 = vmatprep.subr.bf16.mxu0 %v4677_v0  ;;  %4198 = vmatprep.subr.bf16.mxu1 %v4677_v0 }
  0x81   :  { %1265 = vmatpush1.bf16.msra.mxu0 %v4338_v15  ;;  %4214 = vmatpush1.bf16.msra.mxu1 %v4338_v15  ;;  %v4408_v15 = vld [vmem:[#allocation3 + $0x2c] ss:$16 sps:$4 sm:$0xff]  }
  0x82   :  { %1266 = vmatprep.subr.bf16.mxu0 %v4677_v0  ;;  %4199 = vmatprep.subr.bf16.mxu1 %v4677_v0 }
  0x85   :  { %1267 = vmatpush1.bf16.msra.mxu0 %v4339_v16  ;;  %4215 = vmatpush1.bf16.msra.mxu1 %v4339_v16  ;;  %v4474_v16 = vld [vmem:[#allocation3 + $0x2c4] ss:$16 sps:$4 sm:$0xff]  }
  0x86   :  { %1268 = vmatprep.subr.bf16.mxu0 %v4677_v0  ;;  %4200 = vmatprep.subr.bf16.mxu1 %v4677_v0 }
  0x89   :  { %1269 = vmatpush1.bf16.msra.mxu0 %v4340_v17  ;;  %4216 = vmatpush1.bf16.msra.mxu1 %v4340_v17  ;;  %v4476_v17 = vld [vmem:[#allocation3 + $0x2c0] ss:$16 sps:$4 sm:$0xff]  }
  0x8a   :  { %1527 = vmatprep.subr.bf16.mxu0 %v4677_v0 }
  0x8c   :  { %1271 = vmatmul.mubr.bf16.vlgmr.msra.gmra.mrb[0].mxu0 %v4341_v18  ;;  %1399 = vmatmul.mubr.bf16.vlgmr.msra.gmra.mrb[0].mxu1 %v4438_v56  ;;  %v4410_v18 = vld [vmem:[#allocation3 + $0x28] ss:$16 sps:$4 sm:$0xff]   ;;  %v4432_v56 = vld [vmem:[#allocation3 + $0x12c] ss:$16 sps:$4 sm:$0xff]  }
  0x8d   :  { %1528 = vmatpush1.bf16.msra.mxu0 %v4344_v19  ;;  %1278 = vmatprep.mubr.bf16.mxu0 %v4345_v20  ;;  %v4411_v19 = vld [vmem:[#allocation3 + $0x4c] ss:$16 sps:$4 sm:$0xff]   ;;  %v4480_v20 = vld [vmem:[#allocation3 + $0x2e4] ss:$16 sps:$4 sm:$0xff]  }
  0x8e   :  { %1529 = vmatprep.subr.bf16.mxu0 %v4677_v0  ;;  %1406 = vmatprep.mubr.bf16.mxu1 %v4444_v60  ;;  %v4522_v60 = vld [vmem:[#allocation3 + $0x3c4] ss:$16 sps:$4 sm:$0xff]  }
  0x91   :  { %1530 = vmatpush1.bf16.msra.mxu0 %v4348_v21  ;;  %v4482_v21 = vld [vmem:[#allocation3 + $0x2e0] ss:$16 sps:$4 sm:$0xff]  }
  0x92   :  { %1531 = vmatprep.subr.bf16.mxu0 %v4677_v0 }
  0x94   :  { %1279 = vmatmul.mubr.bf16.gmra.mrb[4].mxu0 %v4347_v22  ;;  %1407 = vmatmul.mubr.bf16.gmra.mrb[4].mxu1 %v4446_v61  ;;  %v4413_v22 = vld [vmem:[#allocation3 + $0x48] ss:$16 sps:$4 sm:$0xff]   ;;  %v4524_v61 = vld [vmem:[#allocation3 + $0x3c0] ss:$16 sps:$4 sm:$0xff]  }
  0x95   :  { %1286 = vmatprep.mubr.bf16.mxu0 %v4349_v23  ;;  %1532 = vmatpush1.bf16.msra.mxu0 %v4352_v24  ;;  %v4414_v23 = vld [vmem:[#allocation3 + $0x6c] ss:$16 sps:$4 sm:$0xff]   ;;  %v4486_v24 = vld [vmem:[#allocation3 + $0x304] ss:$16 sps:$4 sm:$0xff]  }
  0x96   :  { %1533 = vmatprep.subr.bf16.mxu0 %v4677_v0 }
  0x99   :  { %1534 = vmatpush1.bf16.msra.mxu0 %v4356_v25  ;;  %v4488_v25 = vld [vmem:[#allocation3 + $0x300] ss:$16 sps:$4 sm:$0xff]  }
  0x9a   :  { %1535 = vmatprep.subr.bf16.mxu0 %v4677_v0 }
  0x9c   :  { %1287 = vmatmul.mubr.bf16.gmra.mrb[8].mxu0 %v4351_v26  ;;  %v4416_v26 = vld [vmem:[#allocation3 + $0x68] ss:$16 sps:$4 sm:$0xff]  }
  0x9d   :  { %1294 = vmatprep.mubr.bf16.mxu0 %v4353_v27  ;;  %1536 = vmatpush1.bf16.msra.mxu0 %v4360_v28  ;;  %v4417_v27 = vld [vmem:[#allocation3 + $0x8c] ss:$16 sps:$4 sm:$0xff]   ;;  %v4492_v28 = vld [vmem:[#allocation3 + $0x324] ss:$16 sps:$4 sm:$0xff]  }
  0x9e   :  { %1537 = vmatprep.subr.bf16.mxu0 %v4677_v0 }
  0xa1   :  { %1538 = vmatpush1.bf16.msra.mxu0 %v4364_v29  ;;  %v4494_v29 = vld [vmem:[#allocation3 + $0x320] ss:$16 sps:$4 sm:$0xff]  }
  0xa2   :  { %1539 = vmatprep.subr.bf16.mxu0 %v4677_v0 }
  0xa4   :  { %1295 = vmatmul.mubr.bf16.gmra.mrb[12].mxu0 %v4355_v30  ;;  %v4419_v30 = vld [vmem:[#allocation3 + $0x88] ss:$16 sps:$4 sm:$0xff]  }
  0xa5   :  { %1302 = vmatprep.mubr.bf16.mxu0 %v4357_v31  ;;  %1540 = vmatpush1.bf16.msra.mxu0 %v4368_v32  ;;  %v4420_v31 = vld [vmem:[#allocation3 + $0xac] ss:$16 sps:$4 sm:$0xff]   ;;  %v4498_v32 = vld [vmem:[#allocation3 + $0x344] ss:$16 sps:$4 sm:$0xff]  }
  0xa6   :  { %1541 = vmatprep.subr.bf16.mxu0 %v4677_v0 }
  0xa9   :  { %1542 = vmatpush1.bf16.msra.mxu0 %v4372_v33  ;;  %v4500_v33 = vld [vmem:[#allocation3 + $0x340] ss:$16 sps:$4 sm:$0xff]  }
  0xaa   :  { %1543 = vmatprep.subr.bf16.mxu0 %v4677_v0 }
  0xac   :  { %1303 = vmatmul.mubr.bf16.gmra.mrb[16].mxu0 %v4359_v34  ;;  %v4422_v34 = vld [vmem:[#allocation3 + $0xa8] ss:$16 sps:$4 sm:$0xff]  }
  0xad   :  { %1310 = vmatprep.mubr.bf16.mxu0 %v4361_v35  ;;  %1544 = vmatpush1.bf16.msra.mxu0 %v4376_v36  ;;  %v4423_v35 = vld [vmem:[#allocation3 + $0xcc] ss:$16 sps:$4 sm:$0xff]   ;;  %v4504_v36 = vld [vmem:[#allocation3 + $0x364] ss:$16 sps:$4 sm:$0xff]  }
  0xae   :  { %1545 = vmatprep.subr.bf16.mxu0 %v4677_v0 }
  0xb1   :  { %1546 = vmatpush1.bf16.msra.mxu0 %v4380_v37  ;;  %v4506_v37 = vld [vmem:[#allocation3 + $0x360] ss:$16 sps:$4 sm:$0xff]  }
  0xb2   :  { %1547 = vmatprep.subr.bf16.mxu0 %v4677_v0 }
  0xb4   :  { %1311 = vmatmul.mubr.bf16.gmra.mrb[20].mxu0 %v4363_v38  ;;  %v4425_v38 = vld [vmem:[#allocation3 + $0xc8] ss:$16 sps:$4 sm:$0xff]  }
  0xb5   :  { %1318 = vmatprep.mubr.bf16.mxu0 %v4365_v39  ;;  %1548 = vmatpush1.bf16.msra.mxu0 %v4384_v40  ;;  %v4426_v39 = vld [vmem:[#allocation3 + $0xec] ss:$16 sps:$4 sm:$0xff]   ;;  %v4510_v40 = vld [vmem:[#allocation3 + $0x384] ss:$16 sps:$4 sm:$0xff]  }
  0xb6   :  { %1549 = vmatprep.subr.bf16.mxu0 %v4677_v0 }
  0xb9   :  { %1550 = vmatpush1.bf16.msra.mxu0 %v4388_v41  ;;  %v4512_v41 = vld [vmem:[#allocation3 + $0x380] ss:$16 sps:$4 sm:$0xff]  }
  0xba   :  { %1551 = vmatprep.subr.bf16.mxu0 %v4677_v0 }
  0xbc   :  { %1319 = vmatmul.mubr.bf16.gmra.mrb[24].mxu0 %v4367_v42  ;;  %v2011_v42 = vld [vmem:[#allocation8] sm:$0xff] }
  0xbd   :  { %1326 = vmatprep.mubr.bf16.mxu0 %v4369_v43  ;;  %1552 = vmatpush1.bf16.msra.mxu0 %v4392_v44  ;;  %v2012_v43 = vld [vmem:[#allocation8 + $0x8] sm:$0xff] }
  0xbe   :  { %1553 = vmatprep.subr.bf16.mxu0 %v4677_v0  ;;  %v4121_v44 = vpack.c.bf16 %v2012_v43, %v2011_v42  ;;  %v4521_v42 = vld [vmem:[#allocation3 + $0x308] ss:$16 sps:$4 sm:$0xff]   ;;  %v4525_v43 = vld [vmem:[#allocation3 + $0x32c] ss:$16 sps:$4 sm:$0xff]  }
  0xc0   :  { %4122 = vmatprep.subr.bf16.mxu1 %v4121_v44 }
  0xc1   :  { %1554 = vmatpush1.bf16.msra.mxu0 %v4396_v45  ;;  %v4428_v45 = vld [vmem:[#allocation3 + $0xe8] ss:$16 sps:$4 sm:$0xff]   ;;  %4124 = vmatpush3.bf16.msra.mxu1 %v4121_v44 }
  0xc2   :  { %1555 = vmatprep.subr.bf16.mxu0 %v4677_v0  ;;  %v4527_v44 = vld [vmem:[#allocation3 + $0x328] ss:$16 sps:$4 sm:$0xff]  }
  0xc4   :  { %1327 = vmatmul.mubr.bf16.gmra.mrb[28].mxu0 %v4371_v46  ;;  %v4429_v46 = vld [vmem:[#allocation3 + $0x10c] ss:$16 sps:$4 sm:$0xff]  }
  0xc5   :  { %1334 = vmatprep.mubr.bf16.mxu0 %v4373_v47  ;;  %1556 = vmatpush1.bf16.msra.mxu0 %v4400_v48  ;;  %v2013_v47 = vld [vmem:[#allocation8 + $0x10] sm:$0xff]  ;;  %v2014_v48 = vld [vmem:[#allocation8 + $0x18] sm:$0xff] }
  0xc6   :  { %1557 = vmatprep.subr.bf16.mxu0 %v4677_v0  ;;  %v4450_v0 = vld [vmem:[#allocation3 + $0x244] ss:$16 sps:$4 sm:$0xff]  }
  0xc7   :  { %1414 = vmatprep.mubr.bf16.mxu1 %v4450_v0 }
  0xc8   :  { %1415 = vmatmul.mubr.bf16.gmra.mrb[8].mxu1 %v4452_v1  ;;  %v4434_v1 = vld [vmem:[#allocation3 + $0x128] ss:$16 sps:$4 sm:$0xff]  }
  0xc9   :  { %1558 = vmatpush1.bf16.msra.mxu0 %v4404_v49  ;;  %1422 = vmatprep.mubr.bf16.mxu1 %v4456_v4  ;;  %v4125_v49 = vpack.c.bf16 %v2014_v48, %v2013_v47  ;;  %v2022_v4 = vld [vmem:[#allocation8 + $0x58] sm:$0xff] }
  0xca   :  { %v4534_v47 = vld [vmem:[#allocation3 + $0x36c] ss:$16 sps:$4 sm:$0xff]  }
  0xcb   :  { %4126 = vmatprep.subr.bf16.mxu1 %v4125_v49 }
  0xcc   :  { %1335 = vmatmul.mubr.bf16.gmra.mrb[32].mxu0 %v4375_v50  ;;  %v4516_v50 = vld [vmem:[#allocation3 + $0x3a4] ss:$16 sps:$4 sm:$0xff]   ;;  %4128 = vmatpush3.bf16.msra.mxu1 %v4125_v49 }
  0xcd   :  { %1342 = vmatprep.mubr.bf16.mxu0 %v4377_v51  ;;  %v4518_v51 = vld [vmem:[#allocation3 + $0x3a0] ss:$16 sps:$4 sm:$0xff]  }
  0xd0   :  { %1423 = vmatmul.mubr.bf16.gmra.mrb[12].mxu1 %v4458_v5 }
  0xd1   :  { %1430 = vmatprep.mubr.bf16.mxu1 %v4462_v8  ;;  %v2023_v8 = vld [vmem:[#allocation8 + $0x60] sm:$0xff] }
  0xd4   :  { %1343 = vmatmul.mubr.bf16.gmra.mrb[36].mxu0 %v4379_v52  ;;  %v2015_v52 = vld [vmem:[#allocation8 + $0x20] sm:$0xff] }
  0xd5   :  { %1350 = vmatprep.mubr.bf16.mxu0 %v4381_v53  ;;  %v2016_v53 = vld [vmem:[#allocation8 + $0x28] sm:$0xff] }
  0xd8   :  { %1431 = vmatmul.mubr.bf16.gmra.mrb[16].mxu1 %v4464_v9  ;;  %v2024_v9 = vld [vmem:[#allocation8 + $0x68] sm:$0xff] }
  0xd9   :  { %1438 = vmatprep.mubr.bf16.mxu1 %v4468_v12  ;;  %v4441_v12 = vld [vmem:[#allocation3 + $0x16c] ss:$16 sps:$4 sm:$0xff]  }
  0xdc   :  { %1351 = vmatmul.mubr.bf16.gmra.mrb[40].mxu0 %v4383_v54  ;;  %v4129_v54 = vpack.c.bf16 %v2016_v53, %v2015_v52 }
  0xdd   :  { %1358 = vmatprep.mubr.bf16.mxu0 %v4385_v55  ;;  %v4431_v55 = vld [vmem:[#allocation3 + $0x108] ss:$16 sps:$4 sm:$0xff]  }
  0xde   :  { %4130 = vmatprep.subr.bf16.mxu1 %v4129_v54 }
  0xdf   :  { %4132 = vmatpush3.bf16.msra.mxu1 %v4129_v54  ;;  %v4536_v54 = vld [vmem:[#allocation3 + $0x368] ss:$16 sps:$4 sm:$0xff]  }
  0xe0   :  { %1439 = vmatmul.mubr.bf16.gmra.mrb[20].mxu1 %v4470_v13  ;;  %v2025_v13 = vld [vmem:[#allocation8 + $0x70] sm:$0xff] }
  0xe1   :  { %1446 = vmatprep.mubr.bf16.mxu1 %v4474_v16  ;;  %v4443_v16 = vld [vmem:[#allocation3 + $0x168] ss:$16 sps:$4 sm:$0xff]  }
  0xe4   :  { %1359 = vmatmul.mubr.bf16.gmra.mrb[44].mxu0 %v4387_v58  ;;  %v2018_v58 = vld [vmem:[#allocation8 + $0x38] sm:$0xff] }
  0xe5   :  { %1366 = vmatprep.mubr.bf16.mxu0 %v4389_v59  ;;  %v4133_v59 = vpack.c.bf16 %v2018_v58, %v2017_v57 }
  0xe7   :  { %4134 = vmatprep.subr.bf16.mxu1 %v4133_v59 }
  0xe8   :  { %1447 = vmatmul.mubr.bf16.gmra.mrb[24].mxu1 %v4476_v17  ;;  %v4447_v17 = vld [vmem:[#allocation3 + $0x18c] ss:$16 sps:$4 sm:$0xff]  }
  0xe9   :  { %1454 = vmatprep.mubr.bf16.mxu1 %v4480_v20  ;;  %4136 = vmatpush3.bf16.msra.mxu1 %v4133_v59  ;;  %v4455_v20 = vld [vmem:[#allocation3 + $0x1a8] ss:$16 sps:$4 sm:$0xff]  }
  0xec   :  { %1367 = vmatmul.mubr.bf16.gmra.mrb[48].mxu0 %v4391_v62  ;;  %v2019_v62 = vld [vmem:[#allocation8 + $0x40] sm:$0xff] }
  0xed   :  { %1374 = vmatprep.mubr.bf16.mxu0 %v4393_v63  ;;  %v2020_v63 = vld [vmem:[#allocation8 + $0x48] sm:$0xff] }
  0xee   :  { %v4137_v0 = vpack.c.bf16 %v2020_v63, %v2019_v62 }
  0xf0   :  { %1455 = vmatmul.mubr.bf16.gmra.mrb[28].mxu1 %v4482_v21  ;;  %4138 = vmatprep.subr.bf16.mxu1 %v4137_v0  ;;  %v4459_v21 = vld [vmem:[#allocation3 + $0x1cc] ss:$16 sps:$4 sm:$0xff]  }
  0xf1   :  { %1462 = vmatprep.mubr.bf16.mxu1 %v4486_v24  ;;  %4140 = vmatpush3.bf16.msra.mxu1 %v4137_v0  ;;  %v4467_v24 = vld [vmem:[#allocation3 + $0x1e8] ss:$16 sps:$4 sm:$0xff]  }
  0xf2   :  { %v4539_v0 = vld [vmem:[#allocation3 + $0x388] ss:$16 sps:$4 sm:$0xff]  }
  0xf4   :  { %1375 = vmatmul.mubr.bf16.gmra.mrb[52].mxu0 %v4395_v2  ;;  %v4435_v2 = vld [vmem:[#allocation3 + $0x14c] ss:$16 sps:$4 sm:$0xff]  }
  0xf5   :  { %1382 = vmatprep.mubr.bf16.mxu0 %v4397_v3  ;;  %v2021_v3 = vld [vmem:[#allocation8 + $0x50] sm:$0xff] }
  0xf6   :  { %v4141_v5 = vpack.c.bf16 %v2022_v4, %v2021_v3 }
  0xf8   :  { %1463 = vmatmul.mubr.bf16.gmra.mrb[32].mxu1 %v4488_v25  ;;  %4142 = vmatprep.subr.bf16.mxu1 %v4141_v5  ;;  %v4471_v25 = vld [vmem:[#allocation3 + $0x20c] ss:$16 sps:$4 sm:$0xff]  }
  0xf9   :  { %1470 = vmatprep.mubr.bf16.mxu1 %v4492_v28  ;;  %4144 = vmatpush3.bf16.msra.mxu1 %v4141_v5  ;;  %v4479_v28 = vld [vmem:[#allocation3 + $0x228] ss:$16 sps:$4 sm:$0xff]  }
  0xfc   :  { %1383 = vmatmul.mubr.bf16.gmra.mrb[56].mxu0 %v4399_v6  ;;  %v4528_v6 = vld [vmem:[#allocation3 + $0x3e4] ss:$16 sps:$4 sm:$0xff]  }
  0xfd   :  { %1390 = vmatprep.mubr.bf16.mxu0 %v4401_v7  ;;  %v4530_v7 = vld [vmem:[#allocation3 + $0x3e0] ss:$16 sps:$4 sm:$0xff]  }
 0x100   :  { %1471 = vmatmul.mubr.bf16.gmra.mrb[36].mxu1 %v4494_v29  ;;  %v4483_v29 = vld [vmem:[#allocation3 + $0x24c] ss:$16 sps:$4 sm:$0xff]  }
 0x101   :  { %1478 = vmatprep.mubr.bf16.mxu1 %v4498_v32  ;;  %v4491_v32 = vld [vmem:[#allocation3 + $0x268] ss:$16 sps:$4 sm:$0xff]  }
 0x104   :  { %1391 = vmatmul.mubr.bf16.gmra.mrb[60].mxu0 %v4403_v10  ;;  %v4145_v10 = vpack.c.bf16 %v2024_v9, %v2023_v8 }
 0x105   :  { %1559 = vmatprep.mubr.bf16.mxu0 %v4407_v11  ;;  %v4437_v11 = vld [vmem:[#allocation3 + $0x148] ss:$16 sps:$4 sm:$0xff]  }
 0x106   :  { %4146 = vmatprep.subr.bf16.mxu1 %v4145_v10 }
 0x107   :  { %4148 = vmatpush3.bf16.msra.mxu1 %v4145_v10  ;;  %v4542_v10 = vld [vmem:[#allocation3 + $0x3a8] ss:$16 sps:$4 sm:$0xff]  }
 0x108   :  { %1479 = vmatmul.mubr.bf16.gmra.mrb[40].mxu1 %v4500_v33  ;;  %v4495_v33 = vld [vmem:[#allocation3 + $0x28c] ss:$16 sps:$4 sm:$0xff]  }
 0x109   :  { %1486 = vmatprep.mubr.bf16.mxu1 %v4504_v36  ;;  %v4503_v36 = vld [vmem:[#allocation3 + $0x2a8] ss:$16 sps:$4 sm:$0xff]  }
 0x10c   :  { %1560 = vmatmul.mubr.bf16.vlgmr.msra.gmra.mrb[0].mxu0 %v4405_v14  ;;  %v2026_v14 = vld [vmem:[#allocation8 + $0x78] sm:$0xff] }
 0x10d   :  { %1567 = vmatprep.mubr.bf16.mxu0 %v4408_v15  ;;  %v4149_v15 = vpack.c.bf16 %v2026_v14, %v2025_v13 }
 0x10f   :  { %4150 = vmatprep.subr.bf16.mxu1 %v4149_v15 }
 0x110   :  { %1487 = vmatmul.mubr.bf16.gmra.mrb[44].mxu1 %v4506_v37  ;;  %v4507_v37 = vld [vmem:[#allocation3 + $0x2cc] ss:$16 sps:$4 sm:$0xff]  }
 0x111   :  { %1494 = vmatprep.mubr.bf16.mxu1 %v4510_v40  ;;  %4152 = vmatpush3.bf16.msra.mxu1 %v4149_v15  ;;  %v4515_v40 = vld [vmem:[#allocation3 + $0x2e8] ss:$16 sps:$4 sm:$0xff]  }
 0x114   :  { %1568 = vmatmul.mubr.bf16.gmra.mrb[4].mxu0 %v4410_v18  ;;  %v4449_v18 = vld [vmem:[#allocation3 + $0x188] ss:$16 sps:$4 sm:$0xff]  }
 0x115   :  { %1575 = vmatprep.mubr.bf16.mxu0 %v4411_v19  ;;  %v4453_v19 = vld [vmem:[#allocation3 + $0x1ac] ss:$16 sps:$4 sm:$0xff]  }
 0x118   :  { %1495 = vmatmul.mubr.bf16.gmra.mrb[48].mxu1 %v4512_v41  ;;  %v4519_v41 = vld [vmem:[#allocation3 + $0x30c] ss:$16 sps:$4 sm:$0xff]  }
 0x119   :  { %1502 = vmatprep.mubr.bf16.mxu1 %v4516_v50 }
 0x11c   :  { %1576 = vmatmul.mubr.bf16.gmra.mrb[8].mxu0 %v4413_v22  ;;  %v4461_v22 = vld [vmem:[#allocation3 + $0x1c8] ss:$16 sps:$4 sm:$0xff]  }
 0x11d   :  { %1583 = vmatprep.mubr.bf16.mxu0 %v4414_v23  ;;  %v4465_v23 = vld [vmem:[#allocation3 + $0x1ec] ss:$16 sps:$4 sm:$0xff]  }
 0x120   :  { %1503 = vmatmul.mubr.bf16.gmra.mrb[52].mxu1 %v4518_v51 }
 0x121   :  { %1510 = vmatprep.mubr.bf16.mxu1 %v4522_v60 }
 0x124   :  { %1584 = vmatmul.mubr.bf16.gmra.mrb[12].mxu0 %v4416_v26  ;;  %v4473_v26 = vld [vmem:[#allocation3 + $0x208] ss:$16 sps:$4 sm:$0xff]  }
 0x125   :  { %1591 = vmatprep.mubr.bf16.mxu0 %v4417_v27  ;;  %v4477_v27 = vld [vmem:[#allocation3 + $0x22c] ss:$16 sps:$4 sm:$0xff]  }
 0x128   :  { %1511 = vmatmul.mubr.bf16.gmra.mrb[56].mxu1 %v4524_v61 }
 0x129   :  { %1518 = vmatprep.mubr.bf16.mxu1 %v4528_v6 }
 0x12c   :  { %1592 = vmatmul.mubr.bf16.gmra.mrb[16].mxu0 %v4419_v30  ;;  %v4485_v30 = vld [vmem:[#allocation3 + $0x248] ss:$16 sps:$4 sm:$0xff]  }
 0x12d   :  { %1599 = vmatprep.mubr.bf16.mxu0 %v4420_v31  ;;  %v4489_v31 = vld [vmem:[#allocation3 + $0x26c] ss:$16 sps:$4 sm:$0xff]  }
 0x130   :  { %1519 = vmatmul.mubr.bf16.gmra.mrb[60].mxu1 %v4530_v7 }
 0x134   :  { %1600 = vmatmul.mubr.bf16.gmra.mrb[20].mxu0 %v4422_v34  ;;  %v4497_v34 = vld [vmem:[#allocation3 + $0x288] ss:$16 sps:$4 sm:$0xff]  }
 0x135   :  { %1607 = vmatprep.mubr.bf16.mxu0 %v4423_v35  ;;  %v4501_v35 = vld [vmem:[#allocation3 + $0x2ac] ss:$16 sps:$4 sm:$0xff]  }
 0x13c   :  { %1608 = vmatmul.mubr.bf16.gmra.mrb[24].mxu0 %v4425_v38  ;;  %v4509_v38 = vld [vmem:[#allocation3 + $0x2c8] ss:$16 sps:$4 sm:$0xff]  }
 0x13d   :  { %1615 = vmatprep.mubr.bf16.mxu0 %v4426_v39  ;;  %v4513_v39 = vld [vmem:[#allocation3 + $0x2ec] ss:$16 sps:$4 sm:$0xff]  }
 0x144   :  { %1616 = vmatmul.mubr.bf16.gmra.mrb[28].mxu0 %v4428_v45  ;;  %v4531_v45 = vld [vmem:[#allocation3 + $0x34c] ss:$16 sps:$4 sm:$0xff]  }
 0x145   :  { %1623 = vmatprep.mubr.bf16.mxu0 %v4429_v46  ;;  %v4533_v46 = vld [vmem:[#allocation3 + $0x348] ss:$16 sps:$4 sm:$0xff]  }
 0x14c   :  { %1624 = vmatmul.mubr.bf16.gmra.mrb[32].mxu0 %v4431_v55 }
 0x14d   :  { %1631 = vmatprep.mubr.bf16.mxu0 %v4432_v56  ;;  %v4537_v56 = vld [vmem:[#allocation3 + $0x38c] ss:$16 sps:$4 sm:$0xff]  }
 0x154   :  { %1632 = vmatmul.mubr.bf16.gmra.mrb[36].mxu0 %v4434_v1 }
 0x155   :  { %1639 = vmatprep.mubr.bf16.mxu0 %v4435_v2  ;;  %v4540_v2 = vld [vmem:[#allocation3 + $0x3ac] ss:$16 sps:$4 sm:$0xff]  }
 0x15c   :  { %1640 = vmatmul.mubr.bf16.gmra.mrb[40].mxu0 %v4437_v11 }
 0x15d   :  { %1647 = vmatprep.mubr.bf16.mxu0 %v4441_v12  ;;  %v4543_v12 = vld [vmem:[#allocation3 + $0x3cc] ss:$16 sps:$4 sm:$0xff]  }
 0x15f   :  { %v4808_v48 = vpop.f32.mrb[0].mxu1 }
 0x160   :  { %v1402_v49 = vpop.f32.mrb[1].mxu1 }
 0x161   :  { %v4810_v50 = vpop.f32.mrb[2].mxu1 }
 0x162   :  { %v1405_v51 = vpop.f32.mrb[3].mxu1 }
 0x164   :  { %1648 = vmatmul.mubr.bf16.gmra.mrb[44].mxu0 %v4443_v16 }
 0x165   :  { %1655 = vmatprep.mubr.bf16.mxu0 %v4447_v17 }
 0x167   :  { %v4812_v58 = vpop.f32.mrb[4].mxu1 }
 0x168   :  { %v1410_v59 = vpop.f32.mrb[5].mxu1 }
 0x169   :  { %v4814_v60 = vpop.f32.mrb[6].mxu1 }
 0x16a   :  { %v1413_v62 = vpop.f32.mrb[7].mxu1 }
 0x16c   :  { %1656 = vmatmul.mubr.bf16.gmra.mrb[48].mxu0 %v4449_v18 }
 0x16d   :  { %1663 = vmatprep.mubr.bf16.mxu0 %v4453_v19 }
 0x174   :  { %1664 = vmatmul.mubr.bf16.gmra.mrb[52].mxu0 %v4455_v20  ;;  %v4545_v20 = vld [vmem:[#allocation3 + $0x3c8] ss:$16 sps:$4 sm:$0xff]  }
 0x175   :  { %1671 = vmatprep.mubr.bf16.mxu0 %v4459_v21 }
 0x17c   :  { %1672 = vmatmul.mubr.bf16.gmra.mrb[56].mxu0 %v4461_v22  ;;  %v4546_v22 = vld [vmem:[#allocation3 + $0x3ec] ss:$16 sps:$4 sm:$0xff]  }
 0x17d   :  { %1679 = vmatprep.mubr.bf16.mxu0 %v4465_v23 }
 0x184   :  { %1680 = vmatmul.mubr.bf16.gmra.mrb[60].mxu0 %v4467_v24 }
 0x185   :  { %1687 = vmatprep.mubr.bf16.mxu0 %v4471_v25 }
 0x18c   :  { %1688 = vmatmul.mubr.bf16.gmra.mrb[64].mxu0 %v4473_v26 }
 0x18d   :  { %1695 = vmatprep.mubr.bf16.mxu0 %v4477_v27 }
 0x194   :  { %1696 = vmatmul.mubr.bf16.gmra.mrb[68].mxu0 %v4479_v28 }
 0x195   :  { %1703 = vmatprep.mubr.bf16.mxu0 %v4483_v29 }
 0x19b   :  { %v4816_v4 = vpop.f32.mrb[8].mxu1 }
 0x19c   :  { %1704 = vmatmul.mubr.bf16.gmra.mrb[72].mxu0 %v4485_v30  ;;  %v1418_v5 = vpop.f32.mrb[9].mxu1  ;;  %v4548_v30 = vld [vmem:[#allocation3 + $0x3e8] ss:$16 sps:$4 sm:$0xff]  }
 0x19d   :  { %1711 = vmatprep.mubr.bf16.mxu0 %v4489_v31  ;;  %v4818_v6 = vpop.f32.mrb[10].mxu1 }
 0x19e   :  { %v1421_v8 = vpop.f32.mrb[11].mxu1 }
 0x1a3   :  { %v4820_v14 = vpop.f32.mrb[12].mxu1 }
 0x1a4   :  { %1712 = vmatmul.mubr.bf16.gmra.mrb[76].mxu0 %v4491_v32  ;;  %v1426_v15 = vpop.f32.mrb[13].mxu1 }
 0x1a5   :  { %1719 = vmatprep.mubr.bf16.mxu0 %v4495_v33  ;;  %v4822_v16 = vpop.f32.mrb[14].mxu1 }
 0x1a6   :  { %v1429_v18 = vpop.f32.mrb[15].mxu1 }
 0x1ab   :  { %v4824_v24 = vpop.f32.mrb[16].mxu1 }
 0x1ac   :  { %1720 = vmatmul.mubr.bf16.gmra.mrb[80].mxu0 %v4497_v34  ;;  %v1434_v25 = vpop.f32.mrb[17].mxu1 }
 0x1ad   :  { %1727 = vmatprep.mubr.bf16.mxu0 %v4501_v35  ;;  %v4826_v26 = vpop.f32.mrb[18].mxu1 }
 0x1ae   :  { %v1437_v28 = vpop.f32.mrb[19].mxu1 }
 0x1b3   :  { %v4828_v33 = vpop.f32.mrb[20].mxu1 }
 0x1b4   :  { %1728 = vmatmul.mubr.bf16.gmra.mrb[84].mxu0 %v4503_v36  ;;  %v1442_v34 = vpop.f32.mrb[21].mxu1 }
 0x1b5   :  { %1735 = vmatprep.mubr.bf16.mxu0 %v4507_v37  ;;  %v4830_v35 = vpop.f32.mrb[22].mxu1 }
 0x1b6   :  { %v1445_v37 = vpop.f32.mrb[23].mxu1 }
 0x1bc   :  { %1736 = vmatmul.mubr.bf16.gmra.mrb[88].mxu0 %v4509_v38 }
 0x1bd   :  { %1743 = vmatprep.mubr.bf16.mxu0 %v4513_v39 }
 0x1c4   :  { %1744 = vmatmul.mubr.bf16.gmra.mrb[92].mxu0 %v4515_v40 }
 0x1c5   :  { %1751 = vmatprep.mubr.bf16.mxu0 %v4519_v41  ;;  %v4832_v41 = vpop.f32.mrb[24].mxu1 }
 0x1cc   :  { %1752 = vmatmul.mubr.bf16.gmra.mrb[96].mxu0 %v4521_v42  ;;  %v1450_v42 = vpop.f32.mrb[25].mxu1 }
 0x1cd   :  { %1759 = vmatprep.mubr.bf16.mxu0 %v4525_v43  ;;  %v4834_v43 = vpop.f32.mrb[26].mxu1 }
 0x1d4   :  { %1760 = vmatmul.mubr.bf16.gmra.mrb[100].mxu0 %v4527_v44 }
 0x1d5   :  { %1767 = vmatprep.mubr.bf16.mxu0 %v4531_v45  ;;  %v1453_v45 = vpop.f32.mrb[27].mxu1 }
 0x1dc   :  { %1768 = vmatmul.mubr.bf16.gmra.mrb[104].mxu0 %v4533_v46 }
 0x1dd   :  { %1775 = vmatprep.mubr.bf16.mxu0 %v4534_v47  ;;  %v4836_v47 = vpop.f32.mrb[28].mxu1 }
 0x1de   :  { %v1458_v51 = vpop.f32.mrb[29].mxu1 }
 0x1df   :  { %v1561_v52 = vpop.f32.mrb[0].mxu0 }
 0x1e0   :  { %v1563_v53 = vpop.f32.mrb[1].mxu0  ;;  %3897 = vmatprep.mubr.f32.mxu1 %v1561_v52 }
 0x1e1   :  { %v1564_v55 = vpop.f32.mrb[2].mxu0  ;;  %v4838_v53 = vpop.f32.mrb[30].mxu1 }
 0x1e2   :  { %v1566_v57 = vpop.f32.mrb[3].mxu0  ;;  %3898 = vmatmul.mubr.f32.vlgmr.msra.gmra.mrb[64].mxu1 %v1564_v55 }
 0x1e4   :  { %1776 = vmatmul.mubr.bf16.gmra.mrb[108].mxu0 %v4536_v54  ;;  %v1461_v54 = vpop.f32.mrb[31].mxu1 }
 0x1e5   :  { %1783 = vmatprep.mubr.bf16.mxu0 %v4537_v56  ;;  %v4840_v55 = vpop.f32.mrb[32].mxu1 }
 0x1e6   :  { %v1466_v56 = vpop.f32.mrb[33].mxu1 }
 0x1e7   :  { %v1569_v61 = vpop.f32.mrb[4].mxu0  ;;  %v4842_v57 = vpop.f32.mrb[34].mxu1 }
 0x1e8   :  { %v1571_v63 = vpop.f32.mrb[5].mxu0  ;;  %3900 = vmatprep.mubr.f32.mxu1 %v1569_v61  ;;  %v1469_v61 = vpop.f32.mrb[35].mxu1 }
 0x1e9   :  { %v1572_v1 = vpop.f32.mrb[6].mxu0  ;;  %v4844_v63 = vpop.f32.mrb[36].mxu1 }
 0x1ea   :  { %v1574_v3 = vpop.f32.mrb[7].mxu0  ;;  %3901 = vmatmul.mubr.f32.gmra.mrb[66].mxu1 %v1572_v1  ;;  %v1474_v1 = vpop.f32.mrb[37].mxu1 }
 0x1eb   :  { %v4846_v3 = vpop.f32.mrb[38].mxu1  ;;  %v2484_v1 = vld [vmem:[#allocation9 + $0x8] sm:$0xff] }
 0x1ec   :  { %1784 = vmatmul.mubr.bf16.gmra.mrb[112].mxu0 %v4539_v0  ;;  %v1477_v5 = vpop.f32.mrb[39].mxu1 }
 0x1ed   :  { %1791 = vmatprep.mubr.bf16.mxu0 %v4540_v2 }
 0x1ef   :  { %v1577_v7 = vpop.f32.mrb[8].mxu0 }
 0x1f0   :  { %v1579_v9 = vpop.f32.mrb[9].mxu0  ;;  %3903 = vmatprep.mubr.f32.mxu1 %v1577_v7  ;;  %v4848_v7 = vpop.f32.mrb[40].mxu1 }
 0x1f1   :  { %v1580_v11 = vpop.f32.mrb[10].mxu0  ;;  %v1482_v8 = vpop.f32.mrb[41].mxu1 }
 0x1f2   :  { %v1582_v13 = vpop.f32.mrb[11].mxu0  ;;  %3904 = vmatmul.mubr.f32.gmra.mrb[68].mxu1 %v1580_v11  ;;  %v4850_v9 = vpop.f32.mrb[42].mxu1 }
 0x1f3   :  { %v1485_v11 = vpop.f32.mrb[43].mxu1 }
 0x1f4   :  { %1792 = vmatmul.mubr.bf16.gmra.mrb[116].mxu0 %v4542_v10  ;;  %v4852_v13 = vpop.f32.mrb[44].mxu1  ;;  %v2485_v11 = vld [vmem:[#allocation9 + $0x10] sm:$0xff] }
 0x1f5   :  { %1799 = vmatprep.mubr.bf16.mxu0 %v4543_v12 }
 0x1f7   :  { %v1585_v17 = vpop.f32.mrb[12].mxu0 }
 0x1f8   :  { %v1587_v19 = vpop.f32.mrb[13].mxu0  ;;  %3906 = vmatprep.mubr.f32.mxu1 %v1585_v17  ;;  %v1490_v17 = vpop.f32.mrb[45].mxu1 }
 0x1f9   :  { %v1588_v21 = vpop.f32.mrb[14].mxu0  ;;  %v4854_v19 = vpop.f32.mrb[46].mxu1 }
 0x1fa   :  { %v1590_v23 = vpop.f32.mrb[15].mxu0  ;;  %3907 = vmatmul.mubr.f32.gmra.mrb[70].mxu1 %v1588_v21 }
 0x1fc   :  { %1800 = vmatmul.mubr.bf16.gmra.mrb[120].mxu0 %v4545_v20  ;;  %v1493_v20 = vpop.f32.mrb[47].mxu1 }
 0x1fd   :  { %1807 = vmatprep.mubr.bf16.mxu0 %v4546_v22  ;;  %v4856_v21 = vpop.f32.mrb[48].mxu1  ;;  %v2488_v20 = vld [vmem:[#allocation9 + $0x28] sm:$0xff] }
 0x1fe   :  { %v1498_v22 = vpop.f32.mrb[49].mxu1 }
 0x1ff   :  { %v1593_v27 = vpop.f32.mrb[16].mxu0  ;;  %v4858_v23 = vpop.f32.mrb[50].mxu1 }
 0x200   :  { %v1595_v29 = vpop.f32.mrb[17].mxu0  ;;  %3909 = vmatprep.mubr.f32.mxu1 %v1593_v27  ;;  %v1501_v27 = vpop.f32.mrb[51].mxu1 }
 0x201   :  { %v1596_v31 = vpop.f32.mrb[18].mxu0  ;;  %v4860_v29 = vpop.f32.mrb[52].mxu1 }
 0x202   :  { %v1598_v32 = vpop.f32.mrb[19].mxu0  ;;  %3910 = vmatmul.mubr.f32.gmra.mrb[72].mxu1 %v1596_v31  ;;  %v1506_v31 = vpop.f32.mrb[53].mxu1 }
 0x203   :  { %v4862_v34 = vpop.f32.mrb[54].mxu1  ;;  %v2490_v31 = vld [vmem:[#allocation9 + $0x38] sm:$0xff] }
 0x204   :  { %1808 = vmatmul.mubr.bf16.gmra.mrb[124].mxu0 %v4548_v30 }
 0x207   :  { %v1601_v36 = vpop.f32.mrb[20].mxu0 }
 0x208   :  { %v1603_v38 = vpop.f32.mrb[21].mxu0  ;;  %3912 = vmatprep.mubr.f32.mxu1 %v1601_v36  ;;  %v1509_v36 = vpop.f32.mrb[55].mxu1 }
 0x209   :  { %v1604_v39 = vpop.f32.mrb[22].mxu0  ;;  %v4864_v37 = vpop.f32.mrb[56].mxu1 }
 0x20a   :  { %v1606_v40 = vpop.f32.mrb[23].mxu0  ;;  %3913 = vmatmul.mubr.f32.gmra.mrb[74].mxu1 %v1604_v39  ;;  %v1514_v38 = vpop.f32.mrb[57].mxu1 }
 0x20b   :  { %v4866_v39 = vpop.f32.mrb[58].mxu1  ;;  %v2491_v38 = vld [vmem:[#allocation9 + $0x40] sm:$0xff] }
 0x20c   :  { %v1517_v42 = vpop.f32.mrb[59].mxu1 }
 0x20d   :  { %v4868_v45 = vpop.f32.mrb[60].mxu1 }
 0x20f   :  { %v1609_v44 = vpop.f32.mrb[24].mxu0 }
 0x210   :  { %v1611_v46 = vpop.f32.mrb[25].mxu0  ;;  %3915 = vmatprep.mubr.f32.mxu1 %v1609_v44 }
 0x211   :  { %v1612_v49 = vpop.f32.mrb[26].mxu0 }
 0x212   :  { %v1614_v52 = vpop.f32.mrb[27].mxu0  ;;  %3916 = vmatmul.mubr.f32.gmra.mrb[76].mxu1 %v1612_v49  ;;  %v1522_v49 = vpop.f32.mrb[61].mxu1 }
 0x213   :  { %v4870_v52 = vpop.f32.mrb[62].mxu1 }
 0x214   :  { %v1525_v54 = vpop.f32.mrb[63].mxu1 }
 0x215   :  { %v2494_v54 = vld [vmem:[#allocation9 + $0x58] sm:$0xff] }
 0x217   :  { %v1617_v59 = vpop.f32.mrb[28].mxu0 }
 0x218   :  { %v1619_v62 = vpop.f32.mrb[29].mxu0  ;;  %3918 = vmatprep.mubr.f32.mxu1 %v1617_v59 }
 0x219   :  { %v1620_v0 = vpop.f32.mrb[30].mxu0 }
 0x21a   :  { %v1622_v2 = vpop.f32.mrb[31].mxu0  ;;  %3919 = vmatmul.mubr.f32.gmra.mrb[78].mxu1 %v1620_v0  ;;  %v2483_v0 = vld [vmem:[#allocation9] sm:$0xff] }
 0x21b   :  { %v4153_v2 = vpack.c.bf16 %v2484_v1, %v2483_v0 }
 0x21d   :  { %4154 = vmatprep.subr.bf16.mxu1 %v4153_v2 }
 0x21e   :  { %4156 = vmatpush3.bf16.msra.mxu1 %v4153_v2 }
 0x21f   :  { %v1625_v10 = vpop.f32.mrb[32].mxu0 }
 0x220   :  { %v1627_v12 = vpop.f32.mrb[33].mxu0  ;;  %3921 = vmatprep.mubr.f32.mxu1 %v1625_v10 }
 0x221   :  { %v1628_v15 = vpop.f32.mrb[34].mxu0  ;;  %v2486_v12 = vld [vmem:[#allocation9 + $0x18] sm:$0xff] }
 0x222   :  { %v1630_v18 = vpop.f32.mrb[35].mxu0  ;;  %3922 = vmatmul.mubr.f32.gmra.mrb[80].mxu1 %v1628_v15  ;;  %v4157_v17 = vpack.c.bf16 %v2486_v12, %v2485_v11 }
 0x223   :  { %v2487_v18 = vld [vmem:[#allocation9 + $0x20] sm:$0xff] }
 0x224   :  { %4158 = vmatprep.subr.bf16.mxu1 %v4157_v17  ;;  %v4161_v22 = vpack.c.bf16 %v2488_v20, %v2487_v18 }
 0x225   :  { %4160 = vmatpush3.bf16.msra.mxu1 %v4157_v17 }
 0x226   :  { %4162 = vmatprep.subr.bf16.mxu1 %v4161_v22 }
 0x227   :  { %v1633_v25 = vpop.f32.mrb[36].mxu0 }
 0x228   :  { %v1635_v28 = vpop.f32.mrb[37].mxu0  ;;  %3924 = vmatprep.mubr.f32.mxu1 %v1633_v25 }
 0x229   :  { %v1636_v30 = vpop.f32.mrb[38].mxu0  ;;  %4164 = vmatpush3.bf16.msra.mxu1 %v4161_v22 }
 0x22a   :  { %v1638_v32 = vpop.f32.mrb[39].mxu0  ;;  %3925 = vmatmul.mubr.f32.gmra.mrb[82].mxu1 %v1636_v30  ;;  %v2489_v30 = vld [vmem:[#allocation9 + $0x30] sm:$0xff] }
 0x22b   :  { %v4165_v36 = vpack.c.bf16 %v2490_v31, %v2489_v30 }
 0x22d   :  { %4166 = vmatprep.subr.bf16.mxu1 %v4165_v36 }
 0x22e   :  { %4168 = vmatpush3.bf16.msra.mxu1 %v4165_v36 }
 0x22f   :  { %v1641_v40 = vpop.f32.mrb[40].mxu0 }
 0x230   :  { %v1643_v44 = vpop.f32.mrb[41].mxu0  ;;  %3927 = vmatprep.mubr.f32.mxu1 %v1641_v40  ;;  %v2492_v40 = vld [vmem:[#allocation9 + $0x48] sm:$0xff] }
 0x231   :  { %v1644_v46 = vpop.f32.mrb[42].mxu0  ;;  %v4169_v42 = vpack.c.bf16 %v2492_v40, %v2491_v38 }
 0x232   :  { %v1646_v51 = vpop.f32.mrb[43].mxu0  ;;  %3928 = vmatmul.mubr.f32.gmra.mrb[84].mxu1 %v1644_v46 }
 0x233   :  { %4170 = vmatprep.subr.bf16.mxu1 %v4169_v42  ;;  %v2493_v51 = vld [vmem:[#allocation9 + $0x50] sm:$0xff] }
 0x234   :  { %4172 = vmatpush3.bf16.msra.mxu1 %v4169_v42 }
 0x237   :  { %v1649_v56 = vpop.f32.mrb[44].mxu0 }
 0x238   :  { %v1651_v59 = vpop.f32.mrb[45].mxu0  ;;  %3930 = vmatprep.mubr.f32.mxu1 %v1649_v56 }
 0x239   :  { %v1652_v61 = vpop.f32.mrb[46].mxu0  ;;  %v4173_v59 = vpack.c.bf16 %v2494_v54, %v2493_v51 }
 0x23a   :  { %v1654_v62 = vpop.f32.mrb[47].mxu0  ;;  %3931 = vmatmul.mubr.f32.gmra.mrb[86].mxu1 %v1652_v61  ;;  %v2495_v61 = vld [vmem:[#allocation9 + $0x60] sm:$0xff] }
 0x23b   :  { %4174 = vmatprep.subr.bf16.mxu1 %v4173_v59  ;;  %v2496_v62 = vld [vmem:[#allocation9 + $0x68] sm:$0xff] }
 0x23c   :  { %4176 = vmatpush3.bf16.msra.mxu1 %v4173_v59  ;;  %v4177_v0 = vpack.c.bf16 %v2496_v62, %v2495_v61 }
 0x23e   :  { %4178 = vmatprep.subr.bf16.mxu1 %v4177_v0 }
 0x23f   :  { %v1657_v5 = vpop.f32.mrb[48].mxu0 }
 0x240   :  { %v1659_v8 = vpop.f32.mrb[49].mxu0  ;;  %3933 = vmatprep.mubr.f32.mxu1 %v1657_v5  ;;  %4180 = vmatpush3.bf16.msra.mxu1 %v4177_v0 }
 0x241   :  { %v1660_v10 = vpop.f32.mrb[50].mxu0  ;;  %v2497_v8 = vld [vmem:[#allocation9 + $0x70] sm:$0xff] }
 0x242   :  { %v1662_v15 = vpop.f32.mrb[51].mxu0  ;;  %3934 = vmatmul.mubr.f32.gmra.mrb[88].mxu1 %v1660_v10  ;;  %v2498_v10 = vld [vmem:[#allocation9 + $0x78] sm:$0xff] }
 0x243   :  { %v4181_v12 = vpack.c.bf16 %v2498_v10, %v2497_v8 }
 0x245   :  { %4182 = vmatprep.subr.bf16.mxu1 %v4181_v12 }
 0x246   :  { %4184 = vmatpush3.bf16.msra.mxu1 %v4181_v12 }
 0x247   :  { %v1665_v25 = vpop.f32.mrb[52].mxu0 }
 0x248   :  { %v1667_v27 = vpop.f32.mrb[53].mxu0  ;;  %3936 = vmatprep.mubr.f32.mxu1 %v1665_v25 }
 0x249   :  { %v1668_v28 = vpop.f32.mrb[54].mxu0 }
 0x24a   :  { %v1670_v32 = vpop.f32.mrb[55].mxu0  ;;  %3937 = vmatmul.mubr.f32.gmra.mrb[90].mxu1 %v1668_v28 }
 0x24f   :  { %v1673_v44 = vpop.f32.mrb[56].mxu0 }
 0x250   :  { %v1675_v46 = vpop.f32.mrb[57].mxu0  ;;  %3939 = vmatprep.mubr.f32.mxu1 %v1673_v44 }
 0x251   :  { %v1676_v49 = vpop.f32.mrb[58].mxu0 }
 0x252   :  { %v1678_v56 = vpop.f32.mrb[59].mxu0  ;;  %3940 = vmatmul.mubr.f32.gmra.mrb[92].mxu1 %v1676_v49 }
 0x257   :  { %v1681_v1 = vpop.f32.mrb[60].mxu0 }
 0x258   :  { %v1683_v2 = vpop.f32.mrb[61].mxu0  ;;  %3942 = vmatprep.mubr.f32.mxu1 %v1681_v1 }
 0x259   :  { %v1684_v5 = vpop.f32.mrb[62].mxu0 }
 0x25a   :  { %v1686_v11 = vpop.f32.mrb[63].mxu0  ;;  %3943 = vmatmul.mubr.f32.gmra.mrb[94].mxu1 %v1684_v5 }
 0x25f   :  { %v1689_v15 = vpop.f32.mrb[64].mxu0 }
 0x260   :  { %v1690_v17 = vadd.f32 %v1689_v15, %v4808_v48  ;;  %v1691_v18 = vpop.f32.mrb[65].mxu0 }
 0x261   :  { %v1692_v20 = vpop.f32.mrb[66].mxu0 }
 0x262   :  { %v1693_v22 = vadd.f32 %v1692_v20, %v4810_v50  ;;  %v1694_v25 = vpop.f32.mrb[67].mxu0  ;;  %3945 = vmatprep.mubr.f32.mxu1 %v1690_v17 }
 0x264   :  { %3946 = vmatmul.mubr.f32.gmra.mrb[96].mxu1 %v1693_v22 }
 0x267   :  { %v1697_v27 = vpop.f32.mrb[68].mxu0 }
 0x268   :  { %v1698_v28 = vadd.f32 %v1697_v27, %v4812_v58  ;;  %v1699_v30 = vpop.f32.mrb[69].mxu0 }
 0x269   :  { %v1700_v31 = vpop.f32.mrb[70].mxu0 }
 0x26a   :  { %v1701_v32 = vadd.f32 %v1700_v31, %v4814_v60  ;;  %v1702_v36 = vpop.f32.mrb[71].mxu0  ;;  %3948 = vmatprep.mubr.f32.mxu1 %v1698_v28 }
 0x26c   :  { %3949 = vmatmul.mubr.f32.gmra.mrb[98].mxu1 %v1701_v32 }
 0x26f   :  { %v1705_v38 = vpop.f32.mrb[72].mxu0 }
 0x270   :  { %v1706_v48 = vadd.f32 %v1705_v38, %v4816_v4  ;;  %v1707_v40 = vpop.f32.mrb[73].mxu0 }
 0x271   :  { %v1708_v42 = vpop.f32.mrb[74].mxu0 }
 0x272   :  { %v1709_v50 = vadd.f32 %v1708_v42, %v4818_v6  ;;  %v1710_v44 = vpop.f32.mrb[75].mxu0  ;;  %3951 = vmatprep.mubr.f32.mxu1 %v1706_v48 }
 0x274   :  { %3952 = vmatmul.mubr.f32.gmra.mrb[100].mxu1 %v1709_v50 }
 0x277   :  { %v1713_v46 = vpop.f32.mrb[76].mxu0 }
 0x278   :  { %v1714_v58 = vadd.f32 %v1713_v46, %v4820_v14  ;;  %v1715_v49 = vpop.f32.mrb[77].mxu0 }
 0x279   :  { %v1716_v51 = vpop.f32.mrb[78].mxu0 }
 0x27a   :  { %v1717_v60 = vadd.f32 %v1716_v51, %v4822_v16  ;;  %v1718_v54 = vpop.f32.mrb[79].mxu0  ;;  %3954 = vmatprep.mubr.f32.mxu1 %v1714_v58 }
 0x27c   :  { %3955 = vmatmul.mubr.f32.gmra.mrb[102].mxu1 %v1717_v60 }
 0x27f   :  { %v1721_v56 = vpop.f32.mrb[80].mxu0 }
 0x280   :  { %v1722_v4 = vadd.f32 %v1721_v56, %v4824_v24  ;;  %v1723_v59 = vpop.f32.mrb[81].mxu0 }
 0x281   :  { %v1724_v61 = vpop.f32.mrb[82].mxu0 }
 0x282   :  { %v1725_v6 = vadd.f32 %v1724_v61, %v4826_v26  ;;  %v1726_v62 = vpop.f32.mrb[83].mxu0  ;;  %3957 = vmatprep.mubr.f32.mxu1 %v1722_v4 }
 0x284   :  { %3958 = vmatmul.mubr.f32.gmra.mrb[104].mxu1 %v1725_v6 }
 0x287   :  { %v1729_v0 = vpop.f32.mrb[84].mxu0 }
 0x288   :  { %v1730_v14 = vadd.f32 %v1729_v0, %v4828_v33  ;;  %v1731_v1 = vpop.f32.mrb[85].mxu0 }
 0x289   :  { %v1732_v2 = vpop.f32.mrb[86].mxu0 }
 0x28a   :  { %v1733_v16 = vadd.f32 %v1732_v2, %v4830_v35  ;;  %v1734_v5 = vpop.f32.mrb[87].mxu0  ;;  %3960 = vmatprep.mubr.f32.mxu1 %v1730_v14 }
 0x28c   :  { %3961 = vmatmul.mubr.f32.gmra.mrb[106].mxu1 %v1733_v16 }
 0x28f   :  { %v1737_v8 = vpop.f32.mrb[88].mxu0 }
 0x290   :  { %v1738_v24 = vadd.f32 %v1737_v8, %v4832_v41  ;;  %v1739_v10 = vpop.f32.mrb[89].mxu0 }
 0x291   :  { %v1740_v11 = vpop.f32.mrb[90].mxu0 }
 0x292   :  { %v1741_v26 = vadd.f32 %v1740_v11, %v4834_v43  ;;  %v1742_v12 = vpop.f32.mrb[91].mxu0  ;;  %3963 = vmatprep.mubr.f32.mxu1 %v1738_v24 }
 0x294   :  { %3964 = vmatmul.mubr.f32.gmra.mrb[108].mxu1 %v1741_v26 }
 0x297   :  { %v1745_v15 = vpop.f32.mrb[92].mxu0 }
 0x298   :  { %v1746_v33 = vadd.f32 %v1745_v15, %v4836_v47  ;;  %v1747_v17 = vpop.f32.mrb[93].mxu0 }
 0x299   :  { %v1748_v18 = vpop.f32.mrb[94].mxu0 }
 0x29a   :  { %v1749_v35 = vadd.f32 %v1748_v18, %v4838_v53  ;;  %v1750_v20 = vpop.f32.mrb[95].mxu0  ;;  %3966 = vmatprep.mubr.f32.mxu1 %v1746_v33 }
 0x29c   :  { %3967 = vmatmul.mubr.f32.gmra.mrb[110].mxu1 %v1749_v35 }
 0x29f   :  { %v1753_v22 = vpop.f32.mrb[96].mxu0 }
 0x2a0   :  { %v1754_v41 = vadd.f32 %v1753_v22, %v4840_v55  ;;  %v1755_v25 = vpop.f32.mrb[97].mxu0 }
 0x2a1   :  { %v1756_v27 = vpop.f32.mrb[98].mxu0 }
 0x2a2   :  { %v1757_v43 = vadd.f32 %v1756_v27, %v4842_v57  ;;  %v1758_v28 = vpop.f32.mrb[99].mxu0  ;;  %3969 = vmatprep.mubr.f32.mxu1 %v1754_v41 }
 0x2a4   :  { %3970 = vmatmul.mubr.f32.gmra.mrb[112].mxu1 %v1757_v43 }
 0x2a7   :  { %v1761_v30 = vpop.f32.mrb[100].mxu0 }
 0x2a8   :  { %v1762_v47 = vadd.f32 %v1761_v30, %v4844_v63  ;;  %v1763_v31 = vpop.f32.mrb[101].mxu0 }
 0x2a9   :  { %v1764_v32 = vpop.f32.mrb[102].mxu0 }
 0x2aa   :  { %v1765_v53 = vadd.f32 %v1764_v32, %v4846_v3  ;;  %v1766_v36 = vpop.f32.mrb[103].mxu0  ;;  %3972 = vmatprep.mubr.f32.mxu1 %v1762_v47 }
 0x2ac   :  { %3973 = vmatmul.mubr.f32.gmra.mrb[114].mxu1 %v1765_v53 }
 0x2af   :  { %v1769_v38 = vpop.f32.mrb[104].mxu0 }
 0x2b0   :  { %v1770_v55 = vadd.f32 %v1769_v38, %v4848_v7  ;;  %v1771_v48 = vpop.f32.mrb[105].mxu0 }
 0x2b1   :  { %v1772_v40 = vpop.f32.mrb[106].mxu0 }
 0x2b2   :  { %v1773_v57 = vadd.f32 %v1772_v40, %v4850_v9  ;;  %v1774_v42 = vpop.f32.mrb[107].mxu0  ;;  %3975 = vmatprep.mubr.f32.mxu1 %v1770_v55 }
 0x2b4   :  { %3976 = vmatmul.mubr.f32.gmra.mrb[116].mxu1 %v1773_v57 }
 0x2b5   :  { %v3899_v50 = vpop.f32.mrb[64].mxu1 }
 0x2b6   :  { %v2100_v44 = vpop.f32.mrb[65].mxu1 }
 0x2b7   :  { %v1777_v63 = vpop.f32.mrb[108].mxu0 }
 0x2b8   :  { %v1778_v46 = vadd.f32 %v1777_v63, %v4852_v13  ;;  %v1779_v58 = vpop.f32.mrb[109].mxu0 }
 0x2b9   :  { %v1780_v3 = vpop.f32.mrb[110].mxu0 }
 0x2ba   :  { %v1781_v49 = vadd.f32 %v1780_v3, %v4854_v19  ;;  %v1782_v51 = vpop.f32.mrb[111].mxu0  ;;  %3978 = vmatprep.mubr.f32.mxu1 %v1778_v46 }
 0x2bc   :  { %3979 = vmatmul.mubr.f32.gmra.mrb[118].mxu1 %v1781_v49 }
 0x2bd   :  { %v3902_v7 = vpop.f32.mrb[66].mxu1 }
 0x2be   :  { %v2110_v60 = vpop.f32.mrb[67].mxu1 }
 0x2bf   :  { %v1785_v54 = vpop.f32.mrb[112].mxu0 }
 0x2c0   :  { %v1786_v9 = vadd.f32 %v1785_v54, %v4856_v21  ;;  %v1787_v56 = vpop.f32.mrb[113].mxu0 }
 0x2c1   :  { %v1788_v4 = vpop.f32.mrb[114].mxu0 }
 0x2c2   :  { %v1789_v59 = vadd.f32 %v1788_v4, %v4858_v23  ;;  %v1790_v61 = vpop.f32.mrb[115].mxu0  ;;  %3981 = vmatprep.mubr.f32.mxu1 %v1786_v9 }
 0x2c4   :  { %3982 = vmatmul.mubr.f32.gmra.mrb[120].mxu1 %v1789_v59 }
 0x2c5   :  { %v3905_v13 = vpop.f32.mrb[68].mxu1 }
 0x2c6   :  { %v2120_v6 = vpop.f32.mrb[69].mxu1 }
 0x2c7   :  { %v1793_v62 = vpop.f32.mrb[116].mxu0 }
 0x2c8   :  { %v1794_v19 = vadd.f32 %v1793_v62, %v4860_v29  ;;  %v1795_v0 = vpop.f32.mrb[117].mxu0  ;;  %v4905_v29 = vld [vmem:[%s4991_s3] ss:$0 sm:$0xff]  ;;  %s4678_s3 = smov [#allocation11]  }
 0x2c9   :  { %v1796_v14 = vpop.f32.mrb[118].mxu0  ;;  %v2101_v12 = vadd.f32 %v4905_v29, %v2100_v44  ;;  %v2106_v18 = vadd.f32 %v3899_v50, %v4905_v29  ;;  %v2111_v22 = vadd.f32 %v4905_v29, %v2110_v60  ;;  %v2116_v27 = vadd.f32 %v3902_v7, %v4905_v29  ;;  %s3209_s21 = sshll.u32 %s4678_s3, 4  ;;  %s3210_s21 = int_to_ptr.vmem [resolvable:$true] %s3209_s21 }
 0x2ca   :  { %v1797_v1 = vadd.f32 %v1796_v14, %v4862_v34  ;;  %v1798_v2 = vpop.f32.mrb[119].mxu0  ;;  %3984 = vmatprep.mubr.f32.mxu1 %v1794_v19  ;;  %s4637_s22 = scalar_lea.vmem %s3210_s21, 4096  ;;  %p4642_p5 = scmp.lt.s32.totalorder %s3210_s21, %s3210_s21 }
 0x2cb   :  { %v2419_v20 = vmax.f32 %v2101_v12, 0.0  ;;  %v2420_v25 = vmax.f32 %v2106_v18, 0.0  ;;  %v2421_v28 = vmax.f32 %v2111_v22, 0.0  ;;  %v2422_v30 = vmax.f32 %v2116_v27, 0.0  ;;  %p4638_p4 = scmp.ne.s32.totalorder %s3210_s21, %s4637_s22  ;;  %p4643_p6 = scmp.lt.s32.totalorder %s4637_s22, %s4637_s22 }
 0x2cc   :  { %3985 = vmatmul.mubr.f32.gmra.mrb[122].mxu1 %v1797_v1 }
 0x2cd   :  { %v3908_v21 = vpop.f32.mrb[70].mxu1  ;;  %p4644_p7 = por %p4643_p6, %p4642_p5 }
 0x2ce   :  { %v2130_v16 = vpop.f32.mrb[71].mxu1  ;;  %v2136_v36 = vadd.f32 %v3908_v21, %v4905_v29 }
 0x2cf   :  { %v1801_v5 = vpop.f32.mrb[120].mxu0  ;;  %v2131_v31 = vadd.f32 %v4905_v29, %v2130_v16  ;;  %p4645_p8 = pnand %p4644_p7, %p4638_p4 }
 0x2d0   :  { %v1802_v23 = vadd.f32 %v1801_v5, %v4864_v37  ;;  %v1803_v8 = vpop.f32.mrb[121].mxu0  ;;  %v2426_v40 = vmax.f32 %v2136_v36, 0.0 }
 0x2d1   :  { %v1804_v24 = vpop.f32.mrb[122].mxu0  ;;  %v2425_v55 = vmax.f32 %v2131_v31, 0.0 }
 0x2d2   :  { %v1805_v10 = vadd.f32 %v1804_v24, %v4866_v39  ;;  %v1806_v11 = vpop.f32.mrb[123].mxu0  ;;  %3987 = vmatprep.mubr.f32.mxu1 %v1802_v23 }
 0x2d4   :  { %3988 = vmatmul.mubr.f32.gmra.mrb[124].mxu1 %v1805_v10 }
 0x2d5   :  { %v3911_v34 = vpop.f32.mrb[72].mxu1 }
 0x2d6   :  { %v2140_v26 = vpop.f32.mrb[73].mxu1  ;;  %v2146_v57 = vadd.f32 %v3911_v34, %v4905_v29 }
 0x2d7   :  { %v1809_v15 = vpop.f32.mrb[124].mxu0  ;;  %v2141_v48 = vadd.f32 %v4905_v29, %v2140_v26 }
 0x2d8   :  { %v1810_v33 = vadd.f32 %v1809_v15, %v4868_v45  ;;  %v1811_v37 = vpop.f32.mrb[125].mxu0  ;;  %v2121_v45 = vadd.f32 %v4905_v29, %v2120_v6  ;;  %v2428_v63 = vmax.f32 %v2146_v57, 0.0 }
 0x2d9   :  { %v1812_v17 = vpop.f32.mrb[126].mxu0  ;;  %v2427_v42 = vmax.f32 %v2141_v48, 0.0 }
 0x2da   :  { %v1813_v39 = vadd.f32 %v1812_v17, %v4870_v52  ;;  %v1814_v35 = vpop.f32.mrb[127].mxu0  ;;  %3990 = vmatprep.mubr.f32.mxu1 %v1810_v33  ;;  %v2126_v52 = vadd.f32 %v3905_v13, %v4905_v29  ;;  %v2423_v47 = vmax.f32 %v2121_v45, 0.0 }
 0x2dc   :  { %3991 = vmatmul.mubr.f32.gmra.mrb[126].mxu1 %v1813_v39  ;;  %v2424_v53 = vmax.f32 %v2126_v52, 0.0 }
 0x2dd   :  { %v3914_v41 = vpop.f32.mrb[74].mxu1  ;;  %4025 = vmatprep.mubr.f32.mxu1 %v2419_v20 }
 0x2de   :  { %v2150_v43 = vpop.f32.mrb[75].mxu1  ;;  %v2156_v46 = vadd.f32 %v3914_v41, %v4905_v29 }
 0x2df   :  { %v2151_v50 = vadd.f32 %v4905_v29, %v2150_v43 }
 0x2e0   :  { %4026 = vmatmul.mubr.f32.vlgmr.msra.gmra.mrb[128].mxu1 %v2420_v25  ;;  %v2430_v51 = vmax.f32 %v2156_v46, 0.0 }
 0x2e1   :  { %4028 = vmatprep.mubr.f32.mxu1 %v2421_v28  ;;  %v2429_v3 = vmax.f32 %v2151_v50, 0.0 }
 0x2e4   :  { %4029 = vmatmul.mubr.f32.gmra.mrb[130].mxu1 %v2422_v30 }
 0x2e5   :  { %v3917_v32 = vpop.f32.mrb[76].mxu1  ;;  %4031 = vmatprep.mubr.f32.mxu1 %v2423_v47 }
 0x2e6   :  { %v2160_v38 = vpop.f32.mrb[77].mxu1  ;;  %v2166_v7 = vadd.f32 %v3917_v32, %v4905_v29 }
 0x2e7   :  { %v2161_v49 = vadd.f32 %v4905_v29, %v2160_v38 }
 0x2e8   :  { %4032 = vmatmul.mubr.f32.gmra.mrb[132].mxu1 %v2424_v53  ;;  %v2432_v56 = vmax.f32 %v2166_v7, 0.0 }
 0x2e9   :  { %4034 = vmatprep.mubr.f32.mxu1 %v2425_v55  ;;  %v2431_v60 = vmax.f32 %v2161_v49, 0.0 }
 0x2ec   :  { %4035 = vmatmul.mubr.f32.gmra.mrb[134].mxu1 %v2426_v40 }
 0x2ed   :  { %v3920_v44 = vpop.f32.mrb[78].mxu1  ;;  %4037 = vmatprep.mubr.f32.mxu1 %v2427_v42 }
 0x2ee   :  { %v2170_v58 = vpop.f32.mrb[79].mxu1  ;;  %v2176_v4 = vadd.f32 %v3920_v44, %v4905_v29 }
 0x2ef   :  { %v2171_v54 = vadd.f32 %v4905_v29, %v2170_v58 }
 0x2f0   :  { %4038 = vmatmul.mubr.f32.gmra.mrb[136].mxu1 %v2428_v63  ;;  %v2434_v6 = vmax.f32 %v2176_v4, 0.0 }
 0x2f1   :  { %4040 = vmatprep.mubr.f32.mxu1 %v2429_v3  ;;  %v2433_v61 = vmax.f32 %v2171_v54, 0.0 }
 0x2f4   :  { %4041 = vmatmul.mubr.f32.gmra.mrb[138].mxu1 %v2430_v51 }
 0x2f5   :  { %v3923_v9 = vpop.f32.mrb[80].mxu1  ;;  %4043 = vmatprep.mubr.f32.mxu1 %v2431_v60 }
 0x2f6   :  { %v2180_v59 = vpop.f32.mrb[81].mxu1  ;;  %v2186_v62 = vadd.f32 %v3923_v9, %v4905_v29 }
 0x2f7   :  { %v2181_v13 = vadd.f32 %v4905_v29, %v2180_v59 }
 0x2f8   :  { %4044 = vmatmul.mubr.f32.gmra.mrb[140].mxu1 %v2432_v56  ;;  %v2436_v14 = vmax.f32 %v2186_v62, 0.0 }
 0x2f9   :  { %4046 = vmatprep.mubr.f32.mxu1 %v2433_v61  ;;  %v2435_v19 = vmax.f32 %v2181_v13, 0.0 }
 0x2fc   :  { %4047 = vmatmul.mubr.f32.gmra.mrb[142].mxu1 %v2434_v6 }
 0x2fd   :  { %v3926_v0 = vpop.f32.mrb[82].mxu1  ;;  %4049 = vmatprep.mubr.f32.mxu1 %v2435_v19 }
 0x2fe   :  { %v2196_v1 = vadd.f32 %v3926_v0, %v4905_v29  ;;  %v2190_v2 = vpop.f32.mrb[83].mxu1 }
 0x2ff   :  { %v2191_v21 = vadd.f32 %v4905_v29, %v2190_v2 }
 0x300   :  { %4050 = vmatmul.mubr.f32.gmra.mrb[144].mxu1 %v2436_v14  ;;  %v2438_v5 = vmax.f32 %v2196_v1, 0.0 }
 0x301   :  { %v2437_v16 = vmax.f32 %v2191_v21, 0.0 }
 0x303   :  { %4052 = vmatprep.mubr.f32.mxu1 %v2437_v16 }
 0x304   :  { %4053 = vmatmul.mubr.f32.gmra.mrb[146].mxu1 %v2438_v5 }
 0x305   :  { %v3929_v23 = vpop.f32.mrb[84].mxu1 }
 0x306   :  { %v2206_v8 = vadd.f32 %v3929_v23, %v4905_v29  ;;  %v2200_v24 = vpop.f32.mrb[85].mxu1 }
 0x307   :  { %v2201_v10 = vadd.f32 %v4905_v29, %v2200_v24 }
 0x308   :  { %v2440_v34 = vmax.f32 %v2206_v8, 0.0 }
 0x309   :  { %v2439_v11 = vmax.f32 %v2201_v10, 0.0 }
 0x30b   :  { %4055 = vmatprep.mubr.f32.mxu1 %v2439_v11 }
 0x30c   :  { %4056 = vmatmul.mubr.f32.gmra.mrb[148].mxu1 %v2440_v34 }
 0x30d   :  { %v3932_v26 = vpop.f32.mrb[86].mxu1 }
 0x30e   :  { %v2216_v12 = vadd.f32 %v3932_v26, %v4905_v29  ;;  %v2210_v15 = vpop.f32.mrb[87].mxu1 }
 0x30f   :  { %v2211_v33 = vadd.f32 %v4905_v29, %v2210_v15 }
 0x310   :  { %v2442_v17 = vmax.f32 %v2216_v12, 0.0 }
 0x311   :  { %v2441_v37 = vmax.f32 %v2211_v33, 0.0 }
 0x313   :  { %4058 = vmatprep.mubr.f32.mxu1 %v2441_v37 }
 0x314   :  { %4059 = vmatmul.mubr.f32.gmra.mrb[150].mxu1 %v2442_v17 }
 0x315   :  { %v3935_v18 = vpop.f32.mrb[88].mxu1 }
 0x316   :  { %v2226_v39 = vadd.f32 %v3935_v18, %v4905_v29  ;;  %v2220_v35 = vpop.f32.mrb[89].mxu1 }
 0x317   :  { %v2221_v20 = vadd.f32 %v4905_v29, %v2220_v35 }
 0x318   :  { %v2444_v41 = vmax.f32 %v2226_v39, 0.0 }
 0x319   :  { %v2443_v22 = vmax.f32 %v2221_v20, 0.0 }
 0x31b   :  { %4061 = vmatprep.mubr.f32.mxu1 %v2443_v22 }
 0x31c   :  { %4062 = vmatmul.mubr.f32.gmra.mrb[152].mxu1 %v2444_v41 }
 0x31d   :  { %v3938_v25 = vpop.f32.mrb[90].mxu1 }
 0x31e   :  { %v2236_v27 = vadd.f32 %v3938_v25, %v4905_v29  ;;  %v2230_v43 = vpop.f32.mrb[91].mxu1 }
 0x31f   :  { %v2231_v28 = vadd.f32 %v4905_v29, %v2230_v43 }
 0x320   :  { %v2446_v30 = vmax.f32 %v2236_v27, 0.0 }
 0x321   :  { %v2445_v45 = vmax.f32 %v2231_v28, 0.0 }
 0x323   :  { %4064 = vmatprep.mubr.f32.mxu1 %v2445_v45 }
 0x324   :  { %4065 = vmatmul.mubr.f32.gmra.mrb[154].mxu1 %v2446_v30 }
 0x325   :  { %v3941_v52 = vpop.f32.mrb[92].mxu1 }
 0x326   :  { %v2246_v47 = vadd.f32 %v3941_v52, %v4905_v29  ;;  %v2240_v31 = vpop.f32.mrb[93].mxu1 }
 0x327   :  { %v2241_v32 = vadd.f32 %v4905_v29, %v2240_v31 }
 0x328   :  { %v2448_v36 = vmax.f32 %v2246_v47, 0.0 }
 0x329   :  { %v2447_v53 = vmax.f32 %v2241_v32, 0.0 }
 0x32b   :  { %4067 = vmatprep.mubr.f32.mxu1 %v2447_v53 }
 0x32c   :  { %4068 = vmatmul.mubr.f32.gmra.mrb[156].mxu1 %v2448_v36 }
 0x32d   :  { %v3944_v38 = vpop.f32.mrb[94].mxu1 }
 0x32e   :  { %v2256_v55 = vadd.f32 %v3944_v38, %v4905_v29  ;;  %v2250_v48 = vpop.f32.mrb[95].mxu1 }
 0x32f   :  { %v2251_v40 = vadd.f32 %v4905_v29, %v2250_v48 }
 0x330   :  { %v2450_v42 = vmax.f32 %v2256_v55, 0.0 }
 0x331   :  { %v2449_v57 = vmax.f32 %v2251_v40, 0.0 }
 0x333   :  { %4070 = vmatprep.mubr.f32.mxu1 %v2449_v57 }
 0x334   :  { %4071 = vmatmul.mubr.f32.gmra.mrb[158].mxu1 %v2450_v42 }
 0x337   :  { %v3947_v50 = vpop.f32.mrb[96].mxu1 }
 0x338   :  { %v2266_v44 = vadd.f32 %v3947_v50, %v4905_v29  ;;  %v2260_v63 = vpop.f32.mrb[97].mxu1 }
 0x339   :  { %v2261_v46 = vadd.f32 %v4905_v29, %v2260_v63 }
 0x33a   :  { %v2452_v3 = vmax.f32 %v2266_v44, 0.0 }
 0x33b   :  { %v2451_v58 = vmax.f32 %v2261_v46, 0.0 }
 0x33d   :  { %4073 = vmatprep.mubr.f32.mxu1 %v2451_v58 }
 0x33e   :  { %4074 = vmatmul.mubr.f32.gmra.mrb[160].mxu1 %v2452_v3 }
 0x33f   :  { %v3950_v49 = vpop.f32.mrb[98].mxu1 }
 0x340   :  { %v2276_v51 = vadd.f32 %v3950_v49, %v4905_v29  ;;  %v2270_v7 = vpop.f32.mrb[99].mxu1 }
 0x341   :  { %v2271_v60 = vadd.f32 %v4905_v29, %v2270_v7 }
 0x342   :  { %v2454_v9 = vmax.f32 %v2276_v51, 0.0 }
 0x343   :  { %v2453_v54 = vmax.f32 %v2271_v60, 0.0 }
 0x345   :  { %4076 = vmatprep.mubr.f32.mxu1 %v2453_v54 }
 0x346   :  { %4077 = vmatmul.mubr.f32.gmra.mrb[162].mxu1 %v2454_v9 }
 0x347   :  { %v3953_v56 = vpop.f32.mrb[100].mxu1 }
 0x348   :  { %v2286_v4 = vadd.f32 %v3953_v56, %v4905_v29  ;;  %v2280_v59 = vpop.f32.mrb[101].mxu1 }
 0x349   :  { %v2281_v61 = vadd.f32 %v4905_v29, %v2280_v59 }
 0x34a   :  { %v2456_v6 = vmax.f32 %v2286_v4, 0.0 }
 0x34b   :  { %v2455_v13 = vmax.f32 %v2281_v61, 0.0 }
 0x34d   :  { %4079 = vmatprep.mubr.f32.mxu1 %v2455_v13 }
 0x34e   :  { %4080 = vmatmul.mubr.f32.gmra.mrb[164].mxu1 %v2456_v6 }
 0x34f   :  { %v3956_v62 = vpop.f32.mrb[102].mxu1 }
 0x350   :  { %v2296_v19 = vadd.f32 %v3956_v62, %v4905_v29  ;;  %v2290_v0 = vpop.f32.mrb[103].mxu1 }
 0x351   :  { %v2291_v14 = vadd.f32 %v4905_v29, %v2290_v0 }
 0x352   :  { %v2458_v2 = vmax.f32 %v2296_v19, 0.0 }
 0x353   :  { %v2457_v1 = vmax.f32 %v2291_v14, 0.0 }
 0x355   :  { %4082 = vmatprep.mubr.f32.mxu1 %v2457_v1 }
 0x356   :  { %4083 = vmatmul.mubr.f32.gmra.mrb[166].mxu1 %v2458_v2 }
 0x357   :  { %v3959_v21 = vpop.f32.mrb[104].mxu1 }
 0x358   :  { %v2306_v16 = vadd.f32 %v3959_v21, %v4905_v29  ;;  %v2300_v5 = vpop.f32.mrb[105].mxu1 }
 0x359   :  { %v2301_v23 = vadd.f32 %v4905_v29, %v2300_v5 }
 0x35a   :  { %v2460_v24 = vmax.f32 %v2306_v16, 0.0 }
 0x35b   :  { %v2459_v8 = vmax.f32 %v2301_v23, 0.0 }
 0x35d   :  { %4085 = vmatprep.mubr.f32.mxu1 %v2459_v8 }
 0x35e   :  { %4086 = vmatmul.mubr.f32.gmra.mrb[168].mxu1 %v2460_v24 }
 0x35f   :  { %v3962_v10 = vpop.f32.mrb[106].mxu1 }
 0x360   :  { %v2316_v11 = vadd.f32 %v3962_v10, %v4905_v29  ;;  %v2310_v34 = vpop.f32.mrb[107].mxu1 }
 0x361   :  { %v2311_v26 = vadd.f32 %v4905_v29, %v2310_v34 }
 0x362   :  { %v2462_v15 = vmax.f32 %v2316_v11, 0.0 }
 0x363   :  { %v2461_v12 = vmax.f32 %v2311_v26, 0.0 }
 0x365   :  { %4088 = vmatprep.mubr.f32.mxu1 %v2461_v12 }
 0x366   :  { %4089 = vmatmul.mubr.f32.gmra.mrb[170].mxu1 %v2462_v15 }
 0x367   :  { %v3965_v33 = vpop.f32.mrb[108].mxu1 }
 0x368   :  { %v2326_v37 = vadd.f32 %v3965_v33, %v4905_v29  ;;  %v2320_v17 = vpop.f32.mrb[109].mxu1 }
 0x369   :  { %v2321_v18 = vadd.f32 %v4905_v29, %v2320_v17 }
 0x36a   :  { %v2464_v35 = vmax.f32 %v2326_v37, 0.0 }
 0x36b   :  { %v2463_v39 = vmax.f32 %v2321_v18, 0.0 }
 0x36d   :  { %4091 = vmatprep.mubr.f32.mxu1 %v2463_v39 }
 0x36e   :  { %4092 = vmatmul.mubr.f32.gmra.mrb[172].mxu1 %v2464_v35 }
 0x36f   :  { %v3968_v20 = vpop.f32.mrb[110].mxu1 }
 0x370   :  { %v2336_v22 = vadd.f32 %v3968_v20, %v4905_v29  ;;  %v2330_v41 = vpop.f32.mrb[111].mxu1 }
 0x371   :  { %v2331_v25 = vadd.f32 %v4905_v29, %v2330_v41 }
 0x372   :  { %v2466_v43 = vmax.f32 %v2336_v22, 0.0 }
 0x373   :  { %v2465_v27 = vmax.f32 %v2331_v25, 0.0 }
 0x375   :  { %4094 = vmatprep.mubr.f32.mxu1 %v2465_v27 }
 0x376   :  { %4095 = vmatmul.mubr.f32.gmra.mrb[174].mxu1 %v2466_v43 }
 0x377   :  { %v3971_v28 = vpop.f32.mrb[112].mxu1 }
 0x378   :  { %v2346_v45 = vadd.f32 %v3971_v28, %v4905_v29  ;;  %v2340_v30 = vpop.f32.mrb[113].mxu1 }
 0x379   :  { %v2341_v52 = vadd.f32 %v4905_v29, %v2340_v30 }
 0x37a   :  { %v2468_v31 = vmax.f32 %v2346_v45, 0.0 }
 0x37b   :  { %v2467_v47 = vmax.f32 %v2341_v52, 0.0 }
 0x37d   :  { %4097 = vmatprep.mubr.f32.mxu1 %v2467_v47 }
 0x37e   :  { %4098 = vmatmul.mubr.f32.gmra.mrb[176].mxu1 %v2468_v31 }
 0x37f   :  { %v3974_v32 = vpop.f32.mrb[114].mxu1 }
 0x380   :  { %v2356_v53 = vadd.f32 %v3974_v32, %v4905_v29  ;;  %v2350_v36 = vpop.f32.mrb[115].mxu1 }
 0x381   :  { %v2351_v38 = vadd.f32 %v4905_v29, %v2350_v36 }
 0x382   :  { %v2470_v48 = vmax.f32 %v2356_v53, 0.0 }
 0x383   :  { %v2469_v55 = vmax.f32 %v2351_v38, 0.0 }
 0x385   :  { %4100 = vmatprep.mubr.f32.mxu1 %v2469_v55 }
 0x386   :  { %4101 = vmatmul.mubr.f32.gmra.mrb[178].mxu1 %v2470_v48 }
 0x387   :  { %v3977_v40 = vpop.f32.mrb[116].mxu1 }
 0x388   :  { %v2366_v57 = vadd.f32 %v3977_v40, %v4905_v29  ;;  %v2360_v42 = vpop.f32.mrb[117].mxu1 }
 0x389   :  { %v2361_v50 = vadd.f32 %v4905_v29, %v2360_v42 }
 0x38a   :  { %v2472_v63 = vmax.f32 %v2366_v57, 0.0 }
 0x38b   :  { %v2471_v44 = vmax.f32 %v2361_v50, 0.0 }
 0x38d   :  { %4103 = vmatprep.mubr.f32.mxu1 %v2471_v44 }
 0x38e   :  { %4104 = vmatmul.mubr.f32.gmra.mrb[180].mxu1 %v2472_v63 }
 0x38f   :  { %v3980_v46 = vpop.f32.mrb[118].mxu1 }
 0x390   :  { %v2376_v58 = vadd.f32 %v3980_v46, %v4905_v29  ;;  %v2370_v3 = vpop.f32.mrb[119].mxu1 }
 0x391   :  { %v2371_v49 = vadd.f32 %v4905_v29, %v2370_v3 }
 0x392   :  { %v2474_v7 = vmax.f32 %v2376_v58, 0.0 }
 0x393   :  { %v2473_v51 = vmax.f32 %v2371_v49, 0.0 }
 0x395   :  { %4106 = vmatprep.mubr.f32.mxu1 %v2473_v51 }
 0x396   :  { %4107 = vmatmul.mubr.f32.gmra.mrb[182].mxu1 %v2474_v7 }
 0x397   :  { %v3983_v60 = vpop.f32.mrb[120].mxu1 }
 0x398   :  { %v2386_v54 = vadd.f32 %v3983_v60, %v4905_v29  ;;  %v2380_v9 = vpop.f32.mrb[121].mxu1 }
 0x399   :  { %v2381_v56 = vadd.f32 %v4905_v29, %v2380_v9 }
 0x39a   :  { %v2476_v59 = vmax.f32 %v2386_v54, 0.0 }
 0x39b   :  { %v2475_v4 = vmax.f32 %v2381_v56, 0.0 }
 0x39d   :  { %4109 = vmatprep.mubr.f32.mxu1 %v2475_v4 }
 0x39e   :  { %4110 = vmatmul.mubr.f32.gmra.mrb[184].mxu1 %v2476_v59 }
 0x39f   :  { %v3986_v61 = vpop.f32.mrb[122].mxu1 }
 0x3a0   :  { %v2396_v13 = vadd.f32 %v3986_v61, %v4905_v29  ;;  %v2390_v6 = vpop.f32.mrb[123].mxu1 }
 0x3a1   :  { %v2391_v62 = vadd.f32 %v4905_v29, %v2390_v6 }
 0x3a2   :  { %v2478_v0 = vmax.f32 %v2396_v13, 0.0 }
 0x3a3   :  { %v2477_v19 = vmax.f32 %v2391_v62, 0.0 }
 0x3a5   :  { %4112 = vmatprep.mubr.f32.mxu1 %v2477_v19 }
 0x3a6   :  { %4113 = vmatmul.mubr.f32.gmra.mrb[186].mxu1 %v2478_v0 }
 0x3a7   :  { %v3989_v14 = vpop.f32.mrb[124].mxu1 }
 0x3a8   :  { %v2406_v1 = vadd.f32 %v3989_v14, %v4905_v29  ;;  %v2400_v2 = vpop.f32.mrb[125].mxu1 }
 0x3a9   :  { %v2401_v21 = vadd.f32 %v4905_v29, %v2400_v2 }
 0x3aa   :  { %v2480_v5 = vmax.f32 %v2406_v1, 0.0 }
 0x3ab   :  { %v2479_v16 = vmax.f32 %v2401_v21, 0.0 }
 0x3ad   :  { %4115 = vmatprep.mubr.f32.mxu1 %v2479_v16 }
 0x3ae   :  { %4116 = vmatmul.mubr.f32.gmra.mrb[188].mxu1 %v2480_v5 }
 0x3af   :  { %v3992_v23 = vpop.f32.mrb[126].mxu1 }
 0x3b0   :  { %v2416_v8 = vadd.f32 %v3992_v23, %v4905_v29  ;;  %v2410_v24 = vpop.f32.mrb[127].mxu1 }
 0x3b1   :  { %v2411_v10 = vadd.f32 %v4905_v29, %v2410_v24 }
 0x3b2   :  { %v2482_v26 = vmax.f32 %v2416_v8, 0.0 }
 0x3b3   :  { %v2481_v11 = vmax.f32 %v2411_v10, 0.0  ;;  %v4027_v34 = vpop.f32.mrb[128].mxu1 }
 0x3b4   :  { %v2565_v12 = vpop.f32.mrb[129].mxu1 }
 0x3b5   :  { %v3517_v15 = vpack.c.bf16 %v4027_v34, %v2565_v12  ;;  %4118 = vmatprep.mubr.f32.mxu1 %v2481_v11 }
 0x3b6   :  { %4119 = vmatmul.mubr.f32.gmra.mrb[190].mxu1 %v2482_v26 }
 0x3b7   :  { %3518 = vst [vmem:[#allocation11] sm:$0xff] %v3517_v15   ;;  %v4030_v33 = vpop.f32.mrb[130].mxu1 }
 0x3b8   :  { %v2575_v37 = vpop.f32.mrb[131].mxu1 }
 0x3b9   :  { %v3522_v17 = vpack.c.bf16 %v4030_v33, %v2575_v37 }
 0x3bb   :  { %3674 = vst [vmem:[#allocation11 + $0x8] sm:$0xff] %v3522_v17   ;;  %v4033_v18 = vpop.f32.mrb[132].mxu1 }
 0x3bc   :  { %v2585_v39 = vpop.f32.mrb[133].mxu1 }
 0x3bd   :  { %v3527_v35 = vpack.c.bf16 %v4033_v18, %v2585_v39 }
 0x3bf   :  { %3675 = vst [vmem:[#allocation11 + $0x10] sm:$0xff] %v3527_v35   ;;  %v4036_v20 = vpop.f32.mrb[134].mxu1 }
 0x3c0   :  { %v2595_v22 = vpop.f32.mrb[135].mxu1 }
 0x3c1   :  { %v3532_v41 = vpack.c.bf16 %v4036_v20, %v2595_v22 }
 0x3c3   :  { %3676 = vst [vmem:[#allocation11 + $0x18] sm:$0xff] %v3532_v41   ;;  %v4039_v29 = vpop.f32.mrb[136].mxu1 }
 0x3c4   :  { %v2605_v25 = vpop.f32.mrb[137].mxu1 }
 0x3c5   :  { %v3537_v27 = vpack.c.bf16 %v4039_v29, %v2605_v25 }
 0x3c7   :  { %3677 = vst [vmem:[#allocation11 + $0x20] sm:$0xff] %v3537_v27   ;;  %v4042_v43 = vpop.f32.mrb[138].mxu1 }
 0x3c8   :  { %v2615_v28 = vpop.f32.mrb[139].mxu1 }
 0x3c9   :  { %v3542_v45 = vpack.c.bf16 %v4042_v43, %v2615_v28 }
 0x3cb   :  { %3678 = vst [vmem:[#allocation11 + $0x28] sm:$0xff] %v3542_v45   ;;  %v4045_v30 = vpop.f32.mrb[140].mxu1 }
 0x3cc   :  { %v2625_v52 = vpop.f32.mrb[141].mxu1 }
 0x3cd   :  { %v3547_v47 = vpack.c.bf16 %v4045_v30, %v2625_v52 }
 0x3cf   :  { %3679 = vst [vmem:[#allocation11 + $0x30] sm:$0xff] %v3547_v47   ;;  %v4048_v31 = vpop.f32.mrb[142].mxu1 }
 0x3d0   :  { %v2635_v32 = vpop.f32.mrb[143].mxu1 }
 0x3d1   :  { %v3552_v53 = vpack.c.bf16 %v4048_v31, %v2635_v32 }
 0x3d3   :  { %3680 = vst [vmem:[#allocation11 + $0x38] sm:$0xff] %v3552_v53   ;;  %v4051_v36 = vpop.f32.mrb[144].mxu1 }
 0x3d4   :  { %v2645_v38 = vpop.f32.mrb[145].mxu1 }
 0x3d5   :  { %v3557_v55 = vpack.c.bf16 %v4051_v36, %v2645_v38 }
 0x3d7   :  { %3681 = vst [vmem:[#allocation11 + $0x40] sm:$0xff] %v3557_v55   ;;  %v4054_v48 = vpop.f32.mrb[146].mxu1 }
 0x3d8   :  { %v2655_v40 = vpop.f32.mrb[147].mxu1 }
 0x3d9   :  { %v3562_v57 = vpack.c.bf16 %v4054_v48, %v2655_v40 }
 0x3db   :  { %3682 = vst [vmem:[#allocation11 + $0x48] sm:$0xff] %v3562_v57  }
 0x3df   :  { %v4057_v42 = vpop.f32.mrb[148].mxu1 }
 0x3e0   :  { %v2665_v50 = vpop.f32.mrb[149].mxu1 }
 0x3e1   :  { %v3567_v44 = vpack.c.bf16 %v4057_v42, %v2665_v50 }
 0x3e3   :  { %3683 = vst [vmem:[#allocation11 + $0x50] sm:$0xff] %v3567_v44  }
 0x3e7   :  { %v4060_v63 = vpop.f32.mrb[150].mxu1 }
 0x3e8   :  { %v2675_v46 = vpop.f32.mrb[151].mxu1 }
 0x3e9   :  { %v3572_v58 = vpack.c.bf16 %v4060_v63, %v2675_v46 }
 0x3eb   :  { %3684 = vst [vmem:[#allocation11 + $0x58] sm:$0xff] %v3572_v58  }
 0x3ef   :  { %v4063_v3 = vpop.f32.mrb[152].mxu1 }
 0x3f0   :  { %v2685_v49 = vpop.f32.mrb[153].mxu1 }
 0x3f1   :  { %v3577_v51 = vpack.c.bf16 %v4063_v3, %v2685_v49 }
 0x3f3   :  { %3685 = vst [vmem:[#allocation11 + $0x60] sm:$0xff] %v3577_v51  }
 0x3f7   :  { %v4066_v7 = vpop.f32.mrb[154].mxu1 }
 0x3f8   :  { %v2695_v60 = vpop.f32.mrb[155].mxu1 }
 0x3f9   :  { %v3582_v54 = vpack.c.bf16 %v4066_v7, %v2695_v60 }
 0x3fb   :  { %3686 = vst [vmem:[#allocation11 + $0x68] sm:$0xff] %v3582_v54  }
 0x3ff   :  { %v4069_v9 = vpop.f32.mrb[156].mxu1 }
 0x400   :  { %v2705_v56 = vpop.f32.mrb[157].mxu1 }
 0x401   :  { %v3587_v4 = vpack.c.bf16 %v4069_v9, %v2705_v56 }
 0x403   :  { %3687 = vst [vmem:[#allocation11 + $0x70] sm:$0xff] %v3587_v4  }
 0x407   :  { %v4072_v59 = vpop.f32.mrb[158].mxu1 }
 0x408   :  { %v2715_v61 = vpop.f32.mrb[159].mxu1 }
 0x409   :  { %v3592_v13 = vpack.c.bf16 %v4072_v59, %v2715_v61 }
 0x40b   :  { %3688 = vst [vmem:[#allocation11 + $0x78] sm:$0xff] %v3592_v13  }
 0x411   :  { %v4075_v6 = vpop.f32.mrb[160].mxu1 }
 0x412   :  { %v2725_v62 = vpop.f32.mrb[161].mxu1 }
 0x413   :  { %v3597_v19 = vpack.c.bf16 %v4075_v6, %v2725_v62 }
 0x415   :  { %3689 = vst [vmem:[#allocation11 + $0x80] sm:$0xff] %v3597_v19  }
 0x419   :  { %v4078_v0 = vpop.f32.mrb[162].mxu1 }
 0x41a   :  { %v2735_v14 = vpop.f32.mrb[163].mxu1 }
 0x41b   :  { %v3602_v1 = vpack.c.bf16 %v4078_v0, %v2735_v14 }
 0x41d   :  { %3690 = vst [vmem:[#allocation11 + $0x88] sm:$0xff] %v3602_v1  }
 0x421   :  { %v4081_v2 = vpop.f32.mrb[164].mxu1 }
 0x422   :  { %v2745_v21 = vpop.f32.mrb[165].mxu1 }
 0x423   :  { %v3607_v16 = vpack.c.bf16 %v4081_v2, %v2745_v21 }
 0x425   :  { %3691 = vst [vmem:[#allocation11 + $0x90] sm:$0xff] %v3607_v16  }
 0x429   :  { %v4084_v5 = vpop.f32.mrb[166].mxu1 }
 0x42a   :  { %v2755_v23 = vpop.f32.mrb[167].mxu1 }
 0x42b   :  { %v3612_v8 = vpack.c.bf16 %v4084_v5, %v2755_v23 }
 0x42d   :  { %3692 = vst [vmem:[#allocation11 + $0x98] sm:$0xff] %v3612_v8  }
 0x431   :  { %v4087_v24 = vpop.f32.mrb[168].mxu1 }
 0x432   :  { %v2765_v10 = vpop.f32.mrb[169].mxu1 }
 0x433   :  { %v3617_v11 = vpack.c.bf16 %v4087_v24, %v2765_v10 }
 0x435   :  { %3693 = vst [vmem:[#allocation11 + $0xa0] sm:$0xff] %v3617_v11  }
 0x439   :  { %v4090_v34 = vpop.f32.mrb[170].mxu1 }
 0x43a   :  { %v2775_v26 = vpop.f32.mrb[171].mxu1 }
 0x43b   :  { %v3622_v12 = vpack.c.bf16 %v4090_v34, %v2775_v26 }
 0x43d   :  { %3694 = vst [vmem:[#allocation11 + $0xa8] sm:$0xff] %v3622_v12  }
 0x441   :  { %v4093_v15 = vpop.f32.mrb[172].mxu1 }
 0x442   :  { %v2785_v33 = vpop.f32.mrb[173].mxu1 }
 0x443   :  { %v3627_v37 = vpack.c.bf16 %v4093_v15, %v2785_v33 }
 0x445   :  { %3695 = vst [vmem:[#allocation11 + $0xb0] sm:$0xff] %v3627_v37  }
 0x449   :  { %v4096_v17 = vpop.f32.mrb[174].mxu1 }
 0x44a   :  { %v2795_v18 = vpop.f32.mrb[175].mxu1 }
 0x44b   :  { %v3632_v39 = vpack.c.bf16 %v4096_v17, %v2795_v18 }
 0x44d   :  { %3696 = vst [vmem:[#allocation11 + $0xb8] sm:$0xff] %v3632_v39  }
 0x451   :  { %v4099_v35 = vpop.f32.mrb[176].mxu1 }
 0x452   :  { %v2805_v20 = vpop.f32.mrb[177].mxu1 }
 0x453   :  { %v3637_v22 = vpack.c.bf16 %v4099_v35, %v2805_v20 }
 0x455   :  { %3697 = vst [vmem:[#allocation11 + $0xc0] sm:$0xff] %v3637_v22  }
 0x459   :  { %v4102_v41 = vpop.f32.mrb[178].mxu1 }
 0x45a   :  { %v2815_v29 = vpop.f32.mrb[179].mxu1 }
 0x45b   :  { %v3642_v25 = vpack.c.bf16 %v4102_v41, %v2815_v29 }
 0x45d   :  { %3698 = vst [vmem:[#allocation11 + $0xc8] sm:$0xff] %v3642_v25  }
 0x461   :  { %v4105_v27 = vpop.f32.mrb[180].mxu1 }
 0x462   :  { %v2825_v43 = vpop.f32.mrb[181].mxu1 }
 0x463   :  { %v3647_v28 = vpack.c.bf16 %v4105_v27, %v2825_v43 }
 0x465   :  { %3699 = vst [vmem:[#allocation11 + $0xd0] sm:$0xff] %v3647_v28  }
 0x469   :  { %v4108_v45 = vpop.f32.mrb[182].mxu1 }
 0x46a   :  { %v2835_v30 = vpop.f32.mrb[183].mxu1 }
 0x46b   :  { %v3652_v52 = vpack.c.bf16 %v4108_v45, %v2835_v30 }
 0x46d   :  { %3700 = vst [vmem:[#allocation11 + $0xd8] sm:$0xff] %v3652_v52  }
 0x471   :  { %v4111_v47 = vpop.f32.mrb[184].mxu1 }
 0x472   :  { %v2845_v31 = vpop.f32.mrb[185].mxu1 }
 0x473   :  { %v3657_v32 = vpack.c.bf16 %v4111_v47, %v2845_v31 }
 0x475   :  { %3701 = vst [vmem:[#allocation11 + $0xe0] sm:$0xff] %v3657_v32  }
 0x479   :  { %v4114_v53 = vpop.f32.mrb[186].mxu1 }
 0x47a   :  { %v2855_v36 = vpop.f32.mrb[187].mxu1 }
 0x47b   :  { %v3662_v38 = vpack.c.bf16 %v4114_v53, %v2855_v36 }
 0x47d   :  { %3702 = vst [vmem:[#allocation11 + $0xe8] sm:$0xff] %v3662_v38  }
 0x481   :  { %v4117_v55 = vpop.f32.mrb[188].mxu1 }
 0x482   :  { %v2865_v48 = vpop.f32.mrb[189].mxu1 }
 0x483   :  { %v3667_v40 = vpack.c.bf16 %v4117_v55, %v2865_v48 }
 0x485   :  { %3703 = vst [vmem:[#allocation11 + $0xf0] sm:$0xff] %v3667_v40  }
 0x489   :  { %v4120_v57 = vpop.f32.mrb[190].mxu1 }
 0x48a   :  { %v2875_v42 = vpop.f32.mrb[191].mxu1 }
 0x48b   :  { %v3672_v50 = vpack.c.bf16 %v4120_v57, %v2875_v42 }
 0x48d   :  { %3704 = vst [vmem:[#allocation11 + $0xf8] sm:$0xff] %v3672_v50  }
 0x48e   :  { %4648 = shalt.err (!%p4645_p8)
}
 0x48f   :  { %s4649_s25 = scalar_lea.hbm %s4993_s5, 4096 }
 0x490   :  { %p4650_p9 = scmp.ne.s32.totalorder %s4993_s5, %s4649_s25  ;;  %p4653_p10 = scmp.lt.u32.totalorder %s4649_s25, %s4993_s5 }
 0x492   :  { %p4655_p11 = pnand %p4653_p10, %p4650_p9 }
 0x494   :  { %4658 = shalt.err (!%p4655_p11)
}
 0x495   :  { %3215 = dma.vmem_to_hbm [thread:$0]  %s3210_s21, 4096, %s4993_s5, [#allocation5], %s4668_s28, %s4668_s28, %s4669_s29  }
 0x496   :  { %4665 = dma.done.wait [#allocation5], 4096  }
 0x497   :  { %4666 = vsyncadd [#allocation5], 4294963200 }
 0x498   :  { %3219 = vsyncpa [#allocation4], 1 }
 0x499   :  { %3220 = vsyncpa [#allocation7], 1 }
 0x49a   :  { %3221 = vsyncpa [#allocation10], 1 }
 0x49b   :  { %3222 = vsyncpa [#allocation5], 1 }

</bundles_post_ra>
